<compile_context>
chip_gen: v7x
topology: tpu7x:2x2x1
jax: 0.10.0
libtpu: 0.0.40
codegen_flags: <defaults>
</compile_context>

<pallas_src>
import functools
import jax
import jax.numpy as jnp
from jax.experimental import pallas as pl
from jax.experimental.pallas import tpu as pltpu


# ----------------------------------------------------------------------------
# Small helpers
# ----------------------------------------------------------------------------
def _round_up(x, m):
    return ((x + m - 1) // m) * m


# ----------------------------------------------------------------------------
# Pallas kernel: plain matmul (+ optional activation), bf16 operands, f32 acc
# ----------------------------------------------------------------------------
def _matmul_act_kernel(x_ref, w_ref, o_ref, *, act):
    y = jnp.dot(x_ref[...].astype(jnp.bfloat16), w_ref[...],
                preferred_element_type=jnp.float32)
    if act == "relu":
        y = jnp.maximum(y, 0.0)
    o_ref[...] = y.astype(o_ref.dtype)


def matmul_act(x, w, act=None, tile_m=256):
    """x: (M, K) @ w: (K, N) with optional fused activation.  No bias path.

    K is zero-padded to a multiple of 128 (unmasked lane loads on the
    contraction dim); M is padded to a multiple of the row tile.  Weights are
    streamed as bf16; accumulation is f32.
    """
    M, K = x.shape
    N = w.shape[1]
    w = w.astype(jnp.bfloat16)

    Kp = _round_up(K, 128)
    if Kp != K:
        x = jnp.pad(x, ((0, 0), (0, Kp - K)))
        w = jnp.pad(w, ((0, Kp - K), (0, 0)))

    tm = min(tile_m, _round_up(M, 8))
    Mp = _round_up(M, tm)
    if Mp != M:
        x = jnp.pad(x, ((0, Mp - M), (0, 0)))

    out = pl.pallas_call(
        functools.partial(_matmul_act_kernel, act=act),
        out_shape=jax.ShapeDtypeStruct((Mp, N), jnp.float32),
        grid=(Mp // tm,),
        in_specs=[
            pl.BlockSpec((tm, Kp), lambda i: (i, 0)),
            pl.BlockSpec((Kp, N), lambda i: (0, 0)),
        ],
        out_specs=pl.BlockSpec((tm, N), lambda i: (i, 0)),
        compiler_params=pltpu.CompilerParams(
            dimension_semantics=("parallel",)),
    )(x, w)
    return out[:M] if Mp != M else out


# ----------------------------------------------------------------------------
# Pallas kernel: full transformer stack, grid = (batch_block, layer)
# ----------------------------------------------------------------------------
def _layers_kernel(x_ref, ln0g_ref, ln0b_ref, wq_ref, wk_ref, wv_ref,
                   projw_ref, projb_ref, ln1g_ref, ln1b_ref,
                   fc1w_ref, fc1b_ref, fc2w_ref, fc2b_ref,
                   o_ref, attn_sc, *, S, D, H, eps):
    l = pl.program_id(1)
    dh = D // H
    scale = dh ** -0.5

    # o_ref itself is the layer carry (resident across the layer axis for this
    # batch block): initialize it from the input at the first layer.
    @pl.when(l == 0)
    def _():
        o_ref[...] = x_ref[...]

    x = o_ref[...].astype(jnp.float32)                    # (S, D), in VMEM

    def ln(v, g, b):
        mu = jnp.mean(v, axis=-1, keepdims=True)
        vc = v - mu
        var = jnp.mean(vc * vc, axis=-1, keepdims=True)
        return vc * jax.lax.rsqrt(var + eps) * g + b

    # ---- attention branch (pre-norm) ---------------------------------------
    h = ln(x, ln0g_ref[0], ln0b_ref[0]).astype(jnp.bfloat16)
    q = jnp.dot(h, wq_ref[0], preferred_element_type=jnp.float32)   # (S, D)
    k = jnp.dot(h, wk_ref[0], preferred_element_type=jnp.float32)
    v = jnp.dot(h, wv_ref[0], preferred_element_type=jnp.float32)

    # Per-head attention; outputs written straight into column slices of the
    # VMEM scratch, then one fused projection matmul below.
    # TODO(synk): with a 128-aligned head_dim, switch to a single batched
    # einsum over an (H, S, dh) view instead of per-head 2-D dots.
    for hd in range(H):                                   # static unroll (H small)
        c0 = hd * dh
        qh = q[:, c0:c0 + dh].astype(jnp.bfloat16)
        kh = k[:, c0:c0 + dh].astype(jnp.bfloat16)
        vh = v[:, c0:c0 + dh].astype(jnp.bfloat16)
        s = jax.lax.dot_general(qh, kh, (((1,), (1,)), ((), ())),
                                preferred_element_type=jnp.float32) * scale
        m = jnp.max(s, axis=-1, keepdims=True)
        e = jnp.exp(s - m)
        p = e * pl.reciprocal(jnp.sum(e, axis=-1, keepdims=True), approx=True)
        oh = jnp.dot(p.astype(jnp.bfloat16), vh,
                     preferred_element_type=jnp.float32)            # (S, dh)
        attn_sc[:, c0:c0 + dh] = oh

    attn = jnp.dot(attn_sc[...].astype(jnp.bfloat16), projw_ref[0],
                   preferred_element_type=jnp.float32) + projb_ref[0]
    x = x + attn                                          # residual (in VMEM)

    # ---- MLP branch (CCT layer: x = norm1(x); x = x + MLP(x)) ---------------
    xn = ln(x, ln1g_ref[0], ln1b_ref[0])
    h1 = jnp.dot(xn.astype(jnp.bfloat16), fc1w_ref[0],
                 preferred_element_type=jnp.float32) + fc1b_ref[0]
    h1 = jax.nn.gelu(h1, approximate=True)                # tanh GELU -> EUP slot
    h2 = jnp.dot(h1.astype(jnp.bfloat16), fc2w_ref[0],
                 preferred_element_type=jnp.float32) + fc2b_ref[0]
    o_ref[...] = (xn + h2).astype(o_ref.dtype)            # carry / final output


def transformer_layers(x_flat, layers_params, *, B, S, D, H, eps=1e-5):
    """x_flat: (B*S, D) f32.  All layers in one pallas_call, grid=(B, L)."""
    if not layers_params:
        return x_flat
    L = len(layers_params)
    stack_f32 = lambda name: jnp.stack([lp[name] for lp in layers_params], 0)
    stack_bf16 = lambda name: stack_f32(name).astype(jnp.bfloat16)

    ln0g, ln0b = stack_f32("ln0_g"), stack_f32("ln0_b")    # (L, 1, D)
    qkvw = stack_bf16("qkv_w")                             # (L, D, 3D) bf16
    wq, wk, wv = qkvw[:, :, :D], qkvw[:, :, D:2 * D], qkvw[:, :, 2 * D:]
    projw, projb = stack_bf16("proj_w"), stack_f32("proj_b")
    ln1g, ln1b = stack_f32("ln1_g"), stack_f32("ln1_b")
    fc1w, fc1b = stack_bf16("fc1_w"), stack_f32("fc1_b")   # (L, D, hid)/(L,1,hid)
    fc2w, fc2b = stack_bf16("fc2_w"), stack_f32("fc2_b")   # (L, hid, D)/(L,1,D)
    hid = fc1w.shape[-1]

    def per_layer(shape):  # one block per layer, streamed & double-buffered
        n = len(shape)
        return pl.BlockSpec((1,) + shape, lambda b, l, _n=n: (l,) + (0,) * _n)

    x_spec = pl.BlockSpec((S, D), lambda b, l: (b, 0))     # per-batch block

    return pl.pallas_call(
        functools.partial(_layers_kernel, S=S, D=D, H=H, eps=eps),
        out_shape=jax.ShapeDtypeStruct((B * S, D), jnp.float32),
        grid=(B, L),
        in_specs=[
            x_spec,
            per_layer((1, D)), per_layer((1, D)),          # ln0 g/b
            per_layer((D, D)), per_layer((D, D)), per_layer((D, D)),  # q/k/v
            per_layer((D, D)), per_layer((1, D)),          # proj w/b
            per_layer((1, D)), per_layer((1, D)),          # ln1 g/b
            per_layer((D, hid)), per_layer((1, hid)),      # fc1 w/b
            per_layer((hid, D)), per_layer((1, D)),        # fc2 w/b
        ],
        out_specs=x_spec,
        scratch_shapes=[pltpu.VMEM((S, D), jnp.float32)],  # per-head attn slab
        compiler_params=pltpu.CompilerParams(
            dimension_semantics=("parallel", "arbitrary"),  # batch || , layer seq
            vmem_limit_bytes=48 * 1024 * 1024),
    )(x_flat, ln0g, ln0b, wq, wk, wv, projw, projb,
      ln1g, ln1b, fc1w, fc1b, fc2w, fc2b)


# ----------------------------------------------------------------------------
# Pallas kernel: final LayerNorm + seq-pool + task classifier head (fused)
# ----------------------------------------------------------------------------
def _head_kernel(x_ref, lng_ref, lnb_ref, pw_ref, pb_ref, fw_ref, fb_ref,
                 ix_ref, ax_ref, feat_ref, *, eps):
    x = x_ref[0].astype(jnp.float32)                      # (S, D)
    mu = jnp.mean(x, axis=-1, keepdims=True)
    xc = x - mu
    var = jnp.mean(xc * xc, axis=-1, keepdims=True)
    xn = xc * jax.lax.rsqrt(var + eps) * lng_ref[...] + lnb_ref[...]   # (S, D)

    # seq-pool scores computed directly in (1, S) lane layout (no transpose)
    aw = jax.lax.dot_general(pw_ref[...], xn, (((1,), (1,)), ((), ())),
                             preferred_element_type=jnp.float32) + pb_ref[0, 0]
    m = jnp.max(aw, axis=-1, keepdims=True)                # softmax over sequence
    e = jnp.exp(aw - m)
    a = e * pl.reciprocal(jnp.sum(e, axis=-1, keepdims=True), approx=True)

    feat = jnp.dot(a, xn, preferred_element_type=jnp.float32)          # (1, D)
    ix = jnp.dot(feat, fw_ref[...],
                 preferred_element_type=jnp.float32) + fb_ref[...]      # (1, C)

    ix_ref[0] = ix
    ax_ref[0] = a
    feat_ref[0] = feat


def head(x, lng, lnb, pw, pb, fw, fb, eps=1e-5):
    B, S, D = x.shape
    C = fw.shape[1]

    def full(arr):
        return pl.BlockSpec(arr.shape, lambda b, _n=arr.ndim: (0,) * _n)

    ix, ax, feat = pl.pallas_call(
        functools.partial(_head_kernel, eps=eps),
        out_shape=(
            jax.ShapeDtypeStruct((B, 1, C), jnp.float32),  # logits
            jax.ShapeDtypeStruct((B, 1, S), jnp.float32),  # seq-pool attention
            jax.ShapeDtypeStruct((B, 1, D), jnp.float32),  # pooled feature
        ),
        grid=(B,),
        in_specs=[pl.BlockSpec((1, S, D), lambda b: (b, 0, 0)),
                  full(lng), full(lnb), full(pw), full(pb), full(fw), full(fb)],
        out_specs=(pl.BlockSpec((1, 1, C), lambda b: (b, 0, 0)),
                   pl.BlockSpec((1, 1, S), lambda b: (b, 0, 0)),
                   pl.BlockSpec((1, 1, D), lambda b: (b, 0, 0))),
        compiler_params=pltpu.CompilerParams(
            dimension_semantics=("parallel",)),
    )(x, lng, lnb, pw, pb, fw, fb)
    return ix[:, 0, :], ax, feat[:, 0, :]


# ----------------------------------------------------------------------------
# Model glue (parameter init + forward)
# ----------------------------------------------------------------------------
def init_params(key, *, img_size, n_input_channels, embedding_dim, num_heads,
                num_layers, mlp_ratio, num_classes, kernel_size, stride,
                padding, pooling_kernel_size, pooling_stride, pooling_padding,
                tasks):
    D = embedding_dim
    Cin = n_input_channels
    hid = int(D * mlp_ratio)
    Ho = (img_size + 2 * padding - kernel_size) // stride + 1
    Hp = (Ho + 2 * pooling_padding - pooling_kernel_size) // pooling_stride + 1
    seq_len = Hp * Hp

    keys = iter(jax.random.split(key, 8 + 8 * num_layers + 2 * tasks))
    nrm = lambda shape, s=0.02: jax.random.normal(next(keys), shape, jnp.float32) * s

    params = {
        "conv_w": nrm((D, Cin, kernel_size, kernel_size)),
        "pos_emb": nrm((1, seq_len, D), 0.2),
        "lnf_g": jnp.ones((1, D), jnp.float32),
        "lnf_b": jnp.zeros((1, D), jnp.float32),
        "pool_w": nrm((1, D)),                    # attention_pool: Linear(D, 1)
        "pool_b": jnp.zeros((1, 1), jnp.float32),
        "layers": [],
        "fc_w": [],
        "fc_b": [],
    }
    for _ in range(num_layers):
        params["layers"].append({
            "ln0_g": jnp.ones((1, D), jnp.float32),
            "ln0_b": jnp.zeros((1, D), jnp.float32),
            "qkv_w": nrm((D, 3 * D)),             # bias=False in CCT attention
            "proj_w": nrm((D, D)),
            "proj_b": jnp.zeros((1, D), jnp.float32),
            "ln1_g": jnp.ones((1, D), jnp.float32),
            "ln1_b": jnp.zeros((1, D), jnp.float32),
            "fc1_w": nrm((D, hid)),
            "fc1_b": jnp.zeros((1, hid), jnp.float32),
            "fc2_w": nrm((hid, D)),
            "fc2_b": jnp.zeros((1, D), jnp.float32),
        })
    for _ in range(tasks):
        params["fc_w"].append(nrm((D, num_classes)))
        params["fc_b"].append(jnp.zeros((1, num_classes), jnp.float32))
    return params


def tokenizer(params, x_nchw, cfg):
    """Conv(k,s,p, bias=False) -> ReLU -> MaxPool(3,2,1) -> flatten to (B,S,D)."""
    B, C, H, W = x_nchw.shape
    k, s, p = cfg["kernel_size"], cfg["stride"], cfg["padding"]
    D = cfg["embedding_dim"]
    Ho = (H + 2 * p - k) // s + 1
    Wo = (W + 2 * p - k) // s + 1

    # im2col (glue)
    xp = jnp.pad(x_nchw, ((0, 0), (0, 0), (p, p), (p, p)))
    cols = []
    for di in range(k):
        for dj in range(k):
            cols.append(jax.lax.slice(
                xp, (0, 0, di, dj),
                (B, C, di + s * (Ho - 1) + 1, dj + s * (Wo - 1) + 1),
                (1, 1, s, s)))                              # (B, C, Ho, Wo)
    patches = jnp.stack(cols, axis=2)                       # (B, C, k*k, Ho, Wo)
    patches = patches.transpose(0, 3, 4, 1, 2).reshape(B * Ho * Wo, C * k * k)

    w = params["conv_w"].reshape(D, C * k * k).T            # (C*k*k, D)
    y = matmul_act(patches, w, act="relu")                  # Pallas, bf16/f32-acc
    y = y.reshape(B, Ho, Wo, D)

    # TODO(synk): max-pool kept in XLA glue (reduce_window); tiny next to the
    # conv-matmul / transformer hot paths.
    y = jax.lax.reduce_window(
        y, -jnp.inf, jax.lax.max,
        window_dimensions=(1, 3, 3, 1),
        window_strides=(1, 2, 2, 1),
        padding=((0, 0), (1, 1), (1, 1), (0, 0)))
    Bp, Hp, Wp, _ = y.shape
    return y.reshape(Bp, Hp * Wp, D)                        # (B, S, D)


def cdcl_forward(params, x_nchw, *, cfg, task=0):
    D = cfg["embedding_dim"]
    H = cfg["num_heads"]

    # --- tokenizer ---
    x = tokenizer(params, x_nchw, cfg)                      # (B, S, D)
    B, S, _ = x.shape

    # --- transformer classifier (learnable positional embedding, seq_pool) ---
    x = x + params["pos_emb"]
    xf = transformer_layers(x.reshape(B * S, D), params["layers"],
                            B=B, S=S, D=D, H=H)             # one Pallas call
    xn = xf.reshape(B, S, D)

    fw, fb = params["fc_w"][task], params["fc_b"][task]
    ix, ax, feat_x = head(xn, params["lnf_g"], params["lnf_b"],
                          params["pool_w"], params["pool_b"], fw, fb)

    # TODO(synk): exact identity of (pkw, pkb)/(kw, kb) in the original
    # TransformerClassifier is unavailable; returning the seq-pool head and the
    # task classifier head parameters respectively.
    pkw, pkb = params["pool_w"], params["pool_b"]
    kw, kb = fw, fb
    return ix, ax, feat_x, (pkw, pkb), (kw, kb)


# ----------------------------------------------------------------------------
if __name__ == "__main__":
    cfg = dict(
        img_size=16,
        n_input_channels=3,
        embedding_dim=64,
        num_heads=4,
        num_layers=2,
        mlp_ratio=2.0,
        num_classes=10,
        kernel_size=7,
        stride=2,
        padding=3,
        pooling_kernel_size=3,
        pooling_stride=2,
        pooling_padding=1,
        tasks=1,
    )
    key = jax.random.PRNGKey(0)
    kp, kx = jax.random.split(key)
    params = init_params(kp, **cfg)
    x = jax.random.normal(
        kx, (2, cfg["n_input_channels"], cfg["img_size"], cfg["img_size"]),
        jnp.float32)

    fwd = jax.jit(functools.partial(cdcl_forward, cfg=cfg, task=0))
    out = fwd(params, x)
    jax.block_until_ready(out)

    ix, ax, feat_x, (pkw, pkb), (kw, kb) = out
    assert ix.shape == (2, cfg["num_classes"])
    assert ax.shape == (2, 1, 16)                 # seq-pool softmax, (B, 1, S)
    assert feat_x.shape == (2, cfg["embedding_dim"])
    print("KERNEL_OK")
</pallas_src>

<mosaic_0001>
module attributes {stable_mosaic.version = 11 : i64} {
  func.func @_matmul_act_kernel(%arg0: i32, %arg1: memref<128x256xf32, #tpu.memory_space<vmem>>, %arg2: memref<256x64xbf16, #tpu.memory_space<vmem>>, %arg3: memref<128x64xf32, #tpu.memory_space<vmem>>) attributes {dimension_semantics = [#tpu.dimension_semantics<parallel>], iteration_bounds = array<i64: 1>, scalar_prefetch = 0 : i64, scratch_operands = 0 : i64, tpu.core_type = #tpu.core_type<tc>, window_params = [{transform_indices = @transform_0, window_bounds = array<i64: 128, 256>}, {pipeline_mode = #tpu.pipeline_mode<synchronous>, transform_indices = @transform_1, window_bounds = array<i64: 256, 64>}, {transform_indices = @transform_2, window_bounds = array<i64: 128, 64>}]} {
    %c0 = arith.constant 0 : index
    %c0_0 = arith.constant 0 : index
    %0 = vector.load %arg1[%c0, %c0_0] : memref<128x256xf32, #tpu.memory_space<vmem>>, vector<128x256xf32>
    %1 = arith.truncf %0 : vector<128x256xf32> to vector<128x256xbf16>
    %c0_1 = arith.constant 0 : index
    %c0_2 = arith.constant 0 : index
    %2 = vector.load %arg2[%c0_1, %c0_2] : memref<256x64xbf16, #tpu.memory_space<vmem>>, vector<256x64xbf16>
    %cst = arith.constant dense<0.000000e+00> : vector<128x64xf32>
    %3 = tpu.matmul %1, %2, %cst {dimension_numbers = #tpu.dot_dimension_numbers<[1], [0], [0], [1], [0, 0, 1, 1], [], []>} : vector<128x256xbf16>, vector<256x64xbf16>, vector<128x64xf32> -> vector<128x64xf32>
    %cst_3 = arith.constant 0.000000e+00 : f32
    %4 = vector.broadcast %cst_3 : f32 to vector<128x64xf32>
    %5 = arith.maximumf %3, %4 : vector<128x64xf32>
    %c0_4 = arith.constant 0 : index
    %c0_5 = arith.constant 0 : index
    %6 = vector.load %arg3[%c0_4, %c0_5] : memref<128x64xf32, #tpu.memory_space<vmem>>, vector<128x64xf32>
    tpu.vector_store %arg3[%c0_4, %c0_5], %5 {strides = array<i32>} : memref<128x64xf32, #tpu.memory_space<vmem>>, vector<128x64xf32>,
    return
  }
  func.func @transform_0(%arg0: i32) -> (i32, i32) {
    %c0_i32 = arith.constant 0 : i32
    %c0_i32_0 = arith.constant 0 : i32
    return %arg0, %c0_i32 : i32, i32
  }
  func.func @transform_1(%arg0: i32) -> (i32, i32) {
    %c0_i32 = arith.constant 0 : i32
    %c0_i32_0 = arith.constant 0 : i32
    %c0_i32_1 = arith.constant 0 : i32
    return %c0_i32, %c0_i32_0 : i32, i32
  }
  func.func @transform_2(%arg0: i32) -> (i32, i32) {
    %c0_i32 = arith.constant 0 : i32
    %c0_i32_0 = arith.constant 0 : i32
    return %arg0, %c0_i32 : i32, i32
  }
}

module attributes {stable_mosaic.version = 11 : i64} {
  func.func @_head_kernel(%arg0: i32, %arg1: memref<1x16x64xf32, #tpu.memory_space<vmem>>, %arg2: memref<1x64xf32, #tpu.memory_space<vmem>>, %arg3: memref<1x64xf32, #tpu.memory_space<vmem>>, %arg4: memref<1x64xf32, #tpu.memory_space<vmem>>, %arg5: memref<1x1xf32, #tpu.memory_space<vmem>>, %arg6: memref<64x10xf32, #tpu.memory_space<vmem>>, %arg7: memref<1x10xf32, #tpu.memory_space<vmem>>, %arg8: memref<1x1x10xf32, #tpu.memory_space<vmem>>, %arg9: memref<1x1x16xf32, #tpu.memory_space<vmem>>, %arg10: memref<1x1x64xf32, #tpu.memory_space<vmem>>) attributes {dimension_semantics = [#tpu.dimension_semantics<parallel>], iteration_bounds = array<i64: 2>, scalar_prefetch = 0 : i64, scratch_operands = 0 : i64, tpu.core_type = #tpu.core_type<tc>, window_params = [{transform_indices = @transform_0, window_bounds = array<i64: 1, 16, 64>}, {pipeline_mode = #tpu.pipeline_mode<synchronous>, transform_indices = @transform_1, window_bounds = array<i64: 1, 64>}, {pipeline_mode = #tpu.pipeline_mode<synchronous>, transform_indices = @transform_2, window_bounds = array<i64: 1, 64>}, {pipeline_mode = #tpu.pipeline_mode<synchronous>, transform_indices = @transform_3, window_bounds = array<i64: 1, 64>}, {pipeline_mode = #tpu.pipeline_mode<synchronous>, transform_indices = @transform_4, window_bounds = array<i64: 1, 1>}, {pipeline_mode = #tpu.pipeline_mode<synchronous>, transform_indices = @transform_5, window_bounds = array<i64: 64, 10>}, {pipeline_mode = #tpu.pipeline_mode<synchronous>, transform_indices = @transform_6, window_bounds = array<i64: 1, 10>}, {transform_indices = @transform_7, window_bounds = array<i64: 1, 1, 10>}, {transform_indices = @transform_8, window_bounds = array<i64: 1, 1, 16>}, {transform_indices = @transform_9, window_bounds = array<i64: 1, 1, 64>}]} {
    %c0 = arith.constant 0 : index
    %c0_0 = arith.constant 0 : index
    %c0_1 = arith.constant 0 : index
    %0 = vector.load %arg1[%c0, %c0_0, %c0_1] : memref<1x16x64xf32, #tpu.memory_space<vmem>>, vector<1x16x64xf32>
    %1 = vector.shape_cast %0 : vector<1x16x64xf32> to vector<16x64xf32>
    %cst = arith.constant dense<0.000000e+00> : vector<16xf32>
    %2 = vector.multi_reduction <add>, %1, %cst [1] : vector<16x64xf32> to vector<16xf32>
    %3 = vector.shape_cast %2 : vector<16xf32> to vector<16x1xf32>
    %cst_2 = arith.constant 6.400000e+01 : f32
    %4 = vector.broadcast %cst_2 : f32 to vector<16x1xf32>
    %5 = arith.divf %3, %4 : vector<16x1xf32>
    %6 = vector.broadcast %5 : vector<16x1xf32> to vector<16x64xf32>
    %7 = arith.subf %1, %6 : vector<16x64xf32>
    %8 = arith.mulf %7, %7 : vector<16x64xf32>
    %cst_3 = arith.constant dense<0.000000e+00> : vector<16xf32>
    %9 = vector.multi_reduction <add>, %8, %cst_3 [1] : vector<16x64xf32> to vector<16xf32>
    %10 = vector.shape_cast %9 : vector<16xf32> to vector<16x1xf32>
    %cst_4 = arith.constant 6.400000e+01 : f32
    %11 = vector.broadcast %cst_4 : f32 to vector<16x1xf32>
    %12 = arith.divf %10, %11 : vector<16x1xf32>
    %cst_5 = arith.constant 9.99999974E-6 : f32
    %13 = vector.broadcast %cst_5 : f32 to vector<16x1xf32>
    %14 = arith.addf %12, %13 : vector<16x1xf32>
    %15 = math.rsqrt %14 : vector<16x1xf32>
    %16 = vector.broadcast %15 : vector<16x1xf32> to vector<16x64xf32>
    %17 = arith.mulf %7, %16 : vector<16x64xf32>
    %c0_6 = arith.constant 0 : index
    %c0_7 = arith.constant 0 : index
    %18 = vector.load %arg2[%c0_6, %c0_7] : memref<1x64xf32, #tpu.memory_space<vmem>>, vector<1x64xf32>
    %19 = vector.broadcast %18 : vector<1x64xf32> to vector<16x64xf32>
    %20 = arith.mulf %17, %19 : vector<16x64xf32>
    %c0_8 = arith.constant 0 : index
    %c0_9 = arith.constant 0 : index
    %21 = vector.load %arg3[%c0_8, %c0_9] : memref<1x64xf32, #tpu.memory_space<vmem>>, vector<1x64xf32>
    %22 = vector.broadcast %21 : vector<1x64xf32> to vector<16x64xf32>
    %23 = arith.addf %20, %22 : vector<16x64xf32>
    %c0_10 = arith.constant 0 : index
    %c0_11 = arith.constant 0 : index
    %24 = vector.load %arg4[%c0_10, %c0_11] : memref<1x64xf32, #tpu.memory_space<vmem>>, vector<1x64xf32>
    %cst_12 = arith.constant dense<0.000000e+00> : vector<1x16xf32>
    %25 = tpu.matmul %24, %23, %cst_12 {dimension_numbers = #tpu.dot_dimension_numbers<[1], [1], [0], [0], [0, 0, 1, 0], [], []>} : vector<1x64xf32>, vector<16x64xf32>, vector<1x16xf32> -> vector<1x16xf32>
    %c0_13 = arith.constant 0 : index
    %c0_14 = arith.constant 0 : index
    %26 = vector.load %arg5[%c0_13, %c0_14] : memref<1x1xf32, #tpu.memory_space<vmem>>, vector<1x1xf32>
    %27 = vector.extract %26[0, 0] : f32 from vector<1x1xf32>
    %28 = vector.broadcast %27 : f32 to vector<1x16xf32>
    %29 = arith.addf %25, %28 : vector<1x16xf32>
    %cst_15 = arith.constant dense<0xFF800000> : vector<1xf32>
    %30 = vector.multi_reduction <maximumf>, %29, %cst_15 [1] : vector<1x16xf32> to vector<1xf32>
    %31 = vector.shape_cast %30 : vector<1xf32> to vector<1x1xf32>
    %32 = vector.broadcast %31 : vector<1x1xf32> to vector<1x16xf32>
    %33 = arith.subf %29, %32 : vector<1x16xf32>
    %34 = math.exp %33 : vector<1x16xf32>
    %cst_16 = arith.constant dense<0.000000e+00> : vector<1xf32>
    %35 = vector.multi_reduction <add>, %34, %cst_16 [1] : vector<1x16xf32> to vector<1xf32>
    %36 = vector.shape_cast %35 : vector<1xf32> to vector<1x1xf32>
    %37 = tpu.reciprocal %36 {approx = true} : vector<1x1xf32> -> vector<1x1xf32>
    %38 = vector.broadcast %37 : vector<1x1xf32> to vector<1x16xf32>
    %39 = arith.mulf %34, %38 : vector<1x16xf32>
    %cst_17 = arith.constant dense<0.000000e+00> : vector<1x64xf32>
    %40 = tpu.matmul %39, %23, %cst_17 {dimension_numbers = #tpu.dot_dimension_numbers<[1], [0], [0], [1], [0, 0, 1, 1], [], []>} : vector<1x16xf32>, vector<16x64xf32>, vector<1x64xf32> -> vector<1x64xf32>
    %c0_18 = arith.constant 0 : index
    %c0_19 = arith.constant 0 : index
    %41 = vector.load %arg6[%c0_18, %c0_19] : memref<64x10xf32, #tpu.memory_space<vmem>>, vector<64x10xf32>
    %cst_20 = arith.constant dense<0.000000e+00> : vector<1x10xf32>
    %42 = tpu.matmul %40, %41, %cst_20 {dimension_numbers = #tpu.dot_dimension_numbers<[1], [0], [0], [1], [0, 0, 1, 1], [], []>} : vector<1x64xf32>, vector<64x10xf32>, vector<1x10xf32> -> vector<1x10xf32>
    %c0_21 = arith.constant 0 : index
    %c0_22 = arith.constant 0 : index
    %43 = vector.load %arg7[%c0_21, %c0_22] : memref<1x10xf32, #tpu.memory_space<vmem>>, vector<1x10xf32>
    %44 = arith.addf %42, %43 : vector<1x10xf32>
    %c0_23 = arith.constant 0 : index
    %c0_24 = arith.constant 0 : index
    %c0_25 = arith.constant 0 : index
    %45 = vector.load %arg8[%c0_23, %c0_24, %c0_25] : memref<1x1x10xf32, #tpu.memory_space<vmem>>, vector<1x1x10xf32>
    %46 = vector.shape_cast %45 : vector<1x1x10xf32> to vector<1x10xf32>
    %47 = vector.shape_cast %44 : vector<1x10xf32> to vector<1x1x10xf32>
    tpu.vector_store %arg8[%c0_23, %c0_24, %c0_25], %47 {strides = array<i32>} : memref<1x1x10xf32, #tpu.memory_space<vmem>>, vector<1x1x10xf32>,
    %c0_26 = arith.constant 0 : index
    %c0_27 = arith.constant 0 : index
    %c0_28 = arith.constant 0 : index
    %48 = vector.load %arg9[%c0_26, %c0_27, %c0_28] : memref<1x1x16xf32, #tpu.memory_space<vmem>>, vector<1x1x16xf32>
    %49 = vector.shape_cast %48 : vector<1x1x16xf32> to vector<1x16xf32>
    %50 = vector.shape_cast %39 : vector<1x16xf32> to vector<1x1x16xf32>
    tpu.vector_store %arg9[%c0_26, %c0_27, %c0_28], %50 {strides = array<i32>} : memref<1x1x16xf32, #tpu.memory_space<vmem>>, vector<1x1x16xf32>,
    %c0_29 = arith.constant 0 : index
    %c0_30 = arith.constant 0 : index
    %c0_31 = arith.constant 0 : index
    %51 = vector.load %arg10[%c0_29, %c0_30, %c0_31] : memref<1x1x64xf32, #tpu.memory_space<vmem>>, vector<1x1x64xf32>
    %52 = vector.shape_cast %51 : vector<1x1x64xf32> to vector<1x64xf32>
    %53 = vector.shape_cast %40 : vector<1x64xf32> to vector<1x1x64xf32>
    tpu.vector_store %arg10[%c0_29, %c0_30, %c0_31], %53 {strides = array<i32>} : memref<1x1x64xf32, #tpu.memory_space<vmem>>, vector<1x1x64xf32>,
    return
  }
  func.func @transform_0(%arg0: i32) -> (i32, i32, i32) {
    %c0_i32 = arith.constant 0 : i32
    %c0_i32_0 = arith.constant 0 : i32
    %c0_i32_1 = arith.constant 0 : i32
    return %arg0, %c0_i32, %c0_i32_0 : i32, i32, i32
  }
  func.func @transform_1(%arg0: i32) -> (i32, i32) {
    %c0_i32 = arith.constant 0 : i32
    %c0_i32_0 = arith.constant 0 : i32
    %c0_i32_1 = arith.constant 0 : i32
    return %c0_i32, %c0_i32_0 : i32, i32
  }
  func.func @transform_2(%arg0: i32) -> (i32, i32) {
    %c0_i32 = arith.constant 0 : i32
    %c0_i32_0 = arith.constant 0 : i32
    %c0_i32_1 = arith.constant 0 : i32
    return %c0_i32, %c0_i32_0 : i32, i32
  }
  func.func @transform_3(%arg0: i32) -> (i32, i32) {
    %c0_i32 = arith.constant 0 : i32
    %c0_i32_0 = arith.constant 0 : i32
    %c0_i32_1 = arith.constant 0 : i32
    return %c0_i32, %c0_i32_0 : i32, i32
  }
  func.func @transform_4(%arg0: i32) -> (i32, i32) {
    %c0_i32 = arith.constant 0 : i32
    %c0_i32_0 = arith.constant 0 : i32
    %c0_i32_1 = arith.constant 0 : i32
    return %c0_i32, %c0_i32_0 : i32, i32
  }
  func.func @transform_5(%arg0: i32) -> (i32, i32) {
    %c0_i32 = arith.constant 0 : i32
    %c0_i32_0 = arith.constant 0 : i32
    %c0_i32_1 = arith.constant 0 : i32
    return %c0_i32, %c0_i32_0 : i32, i32
  }
  func.func @transform_6(%arg0: i32) -> (i32, i32) {
    %c0_i32 = arith.constant 0 : i32
    %c0_i32_0 = arith.constant 0 : i32
    %c0_i32_1 = arith.constant 0 : i32
    return %c0_i32, %c0_i32_0 : i32, i32
  }
  func.func @transform_7(%arg0: i32) -> (i32, i32, i32) {
    %c0_i32 = arith.constant 0 : i32
    %c0_i32_0 = arith.constant 0 : i32
    %c0_i32_1 = arith.constant 0 : i32
    return %arg0, %c0_i32, %c0_i32_0 : i32, i32, i32
  }
  func.func @transform_8(%arg0: i32) -> (i32, i32, i32) {
    %c0_i32 = arith.constant 0 : i32
    %c0_i32_0 = arith.constant 0 : i32
    %c0_i32_1 = arith.constant 0 : i32
    return %arg0, %c0_i32, %c0_i32_0 : i32, i32, i32
  }
  func.func @transform_9(%arg0: i32) -> (i32, i32, i32) {
    %c0_i32 = arith.constant 0 : i32
    %c0_i32_0 = arith.constant 0 : i32
    %c0_i32_1 = arith.constant 0 : i32
    return %arg0, %c0_i32, %c0_i32_0 : i32, i32, i32
  }
}

module attributes {stable_mosaic.version = 11 : i64} {
  func.func @_layers_kernel(%arg0: i32, %arg1: i32, %arg2: memref<16x64xf32, #tpu.memory_space<vmem>>, %arg3: memref<1x1x64xf32, #tpu.memory_space<vmem>>, %arg4: memref<1x1x64xf32, #tpu.memory_space<vmem>>, %arg5: memref<1x64x64xbf16, #tpu.memory_space<vmem>>, %arg6: memref<1x64x64xbf16, #tpu.memory_space<vmem>>, %arg7: memref<1x64x64xbf16, #tpu.memory_space<vmem>>, %arg8: memref<1x64x64xbf16, #tpu.memory_space<vmem>>, %arg9: memref<1x1x64xf32, #tpu.memory_space<vmem>>, %arg10: memref<1x1x64xf32, #tpu.memory_space<vmem>>, %arg11: memref<1x1x64xf32, #tpu.memory_space<vmem>>, %arg12: memref<1x64x128xbf16, #tpu.memory_space<vmem>>, %arg13: memref<1x1x128xf32, #tpu.memory_space<vmem>>, %arg14: memref<1x128x64xbf16, #tpu.memory_space<vmem>>, %arg15: memref<1x1x64xf32, #tpu.memory_space<vmem>>, %arg16: memref<16x64xf32, #tpu.memory_space<vmem>>, %arg17: memref<16x64xf32, #tpu.memory_space<vmem>>) attributes {dimension_semantics = [#tpu.dimension_semantics<parallel>, #tpu.dimension_semantics<arbitrary>], iteration_bounds = array<i64: 2, 2>, scalar_prefetch = 0 : i64, scratch_operands = 1 : i64, tpu.core_type = #tpu.core_type<tc>, window_params = [{transform_indices = @transform_0, window_bounds = array<i64: 16, 64>}, {transform_indices = @transform_1, window_bounds = array<i64: 1, 1, 64>}, {transform_indices = @transform_2, window_bounds = array<i64: 1, 1, 64>}, {transform_indices = @transform_3, window_bounds = array<i64: 1, 64, 64>}, {transform_indices = @transform_4, window_bounds = array<i64: 1, 64, 64>}, {transform_indices = @transform_5, window_bounds = array<i64: 1, 64, 64>}, {transform_indices = @transform_6, window_bounds = array<i64: 1, 64, 64>}, {transform_indices = @transform_7, window_bounds = array<i64: 1, 1, 64>}, {transform_indices = @transform_8, window_bounds = array<i64: 1, 1, 64>}, {transform_indices = @transform_9, window_bounds = array<i64: 1, 1, 64>}, {transform_indices = @transform_10, window_bounds = array<i64: 1, 64, 128>}, {transform_indices = @transform_11, window_bounds = array<i64: 1, 1, 128>}, {transform_indices = @transform_12, window_bounds = array<i64: 1, 128, 64>}, {transform_indices = @transform_13, window_bounds = array<i64: 1, 1, 64>}, {transform_indices = @transform_14, window_bounds = array<i64: 16, 64>}]} {
    %c0_i32 = arith.constant 0 : i32
    %0 = arith.cmpi eq, %arg1, %c0_i32 : i32
    %1 = arith.extui %0 : i1 to i32
    %c0_i32_0 = arith.constant 0 : i32
    %2 = arith.cmpi ne, %1, %c0_i32_0 : i32
    scf.if %2 {
      %c0_89 = arith.constant 0 : index
      %c0_90 = arith.constant 0 : index
      %191 = vector.load %arg2[%c0_89, %c0_90] : memref<16x64xf32, #tpu.memory_space<vmem>>, vector<16x64xf32>
      %c0_91 = arith.constant 0 : index
      %c0_92 = arith.constant 0 : index
      %192 = vector.load %arg16[%c0_91, %c0_92] : memref<16x64xf32, #tpu.memory_space<vmem>>, vector<16x64xf32>
      tpu.vector_store %arg16[%c0_91, %c0_92], %191 {strides = array<i32>} : memref<16x64xf32, #tpu.memory_space<vmem>>, vector<16x64xf32>,
    } else {
    }
    %c0 = arith.constant 0 : index
    %c0_1 = arith.constant 0 : index
    %3 = vector.load %arg16[%c0, %c0_1] : memref<16x64xf32, #tpu.memory_space<vmem>>, vector<16x64xf32>
    %c0_2 = arith.constant 0 : index
    %c0_3 = arith.constant 0 : index
    %c0_4 = arith.constant 0 : index
    %4 = vector.load %arg3[%c0_2, %c0_3, %c0_4] : memref<1x1x64xf32, #tpu.memory_space<vmem>>, vector<1x1x64xf32>
    %5 = vector.shape_cast %4 : vector<1x1x64xf32> to vector<1x64xf32>
    %c0_5 = arith.constant 0 : index
    %c0_6 = arith.constant 0 : index
    %c0_7 = arith.constant 0 : index
    %6 = vector.load %arg4[%c0_5, %c0_6, %c0_7] : memref<1x1x64xf32, #tpu.memory_space<vmem>>, vector<1x1x64xf32>
    %7 = vector.shape_cast %6 : vector<1x1x64xf32> to vector<1x64xf32>
    %cst = arith.constant dense<0.000000e+00> : vector<16xf32>
    %8 = vector.multi_reduction <add>, %3, %cst [1] : vector<16x64xf32> to vector<16xf32>
    %9 = vector.shape_cast %8 : vector<16xf32> to vector<16x1xf32>
    %cst_8 = arith.constant 6.400000e+01 : f32
    %10 = vector.broadcast %cst_8 : f32 to vector<16x1xf32>
    %11 = arith.divf %9, %10 : vector<16x1xf32>
    %12 = vector.broadcast %11 : vector<16x1xf32> to vector<16x64xf32>
    %13 = arith.subf %3, %12 : vector<16x64xf32>
    %14 = arith.mulf %13, %13 : vector<16x64xf32>
    %cst_9 = arith.constant dense<0.000000e+00> : vector<16xf32>
    %15 = vector.multi_reduction <add>, %14, %cst_9 [1] : vector<16x64xf32> to vector<16xf32>
    %16 = vector.shape_cast %15 : vector<16xf32> to vector<16x1xf32>
    %cst_10 = arith.constant 6.400000e+01 : f32
    %17 = vector.broadcast %cst_10 : f32 to vector<16x1xf32>
    %18 = arith.divf %16, %17 : vector<16x1xf32>
    %cst_11 = arith.constant 9.99999974E-6 : f32
    %19 = vector.broadcast %cst_11 : f32 to vector<16x1xf32>
    %20 = arith.addf %18, %19 : vector<16x1xf32>
    %21 = math.rsqrt %20 : vector<16x1xf32>
    %22 = vector.broadcast %21 : vector<16x1xf32> to vector<16x64xf32>
    %23 = arith.mulf %13, %22 : vector<16x64xf32>
    %24 = vector.broadcast %5 : vector<1x64xf32> to vector<16x64xf32>
    %25 = arith.mulf %23, %24 : vector<16x64xf32>
    %26 = vector.broadcast %7 : vector<1x64xf32> to vector<16x64xf32>
    %27 = arith.addf %25, %26 : vector<16x64xf32>
    %28 = arith.truncf %27 : vector<16x64xf32> to vector<16x64xbf16>
    %c0_12 = arith.constant 0 : index
    %c0_13 = arith.constant 0 : index
    %c0_14 = arith.constant 0 : index
    %29 = vector.load %arg5[%c0_12, %c0_13, %c0_14] : memref<1x64x64xbf16, #tpu.memory_space<vmem>>, vector<1x64x64xbf16>
    %30 = vector.shape_cast %29 : vector<1x64x64xbf16> to vector<64x64xbf16>
    %cst_15 = arith.constant dense<0.000000e+00> : vector<16x64xf32>
    %31 = tpu.matmul %28, %30, %cst_15 {dimension_numbers = #tpu.dot_dimension_numbers<[1], [0], [0], [1], [0, 0, 1, 1], [], []>} : vector<16x64xbf16>, vector<64x64xbf16>, vector<16x64xf32> -> vector<16x64xf32>
    %c0_16 = arith.constant 0 : index
    %c0_17 = arith.constant 0 : index
    %c0_18 = arith.constant 0 : index
    %32 = vector.load %arg6[%c0_16, %c0_17, %c0_18] : memref<1x64x64xbf16, #tpu.memory_space<vmem>>, vector<1x64x64xbf16>
    %33 = vector.shape_cast %32 : vector<1x64x64xbf16> to vector<64x64xbf16>
    %cst_19 = arith.constant dense<0.000000e+00> : vector<16x64xf32>
    %34 = tpu.matmul %28, %33, %cst_19 {dimension_numbers = #tpu.dot_dimension_numbers<[1], [0], [0], [1], [0, 0, 1, 1], [], []>} : vector<16x64xbf16>, vector<64x64xbf16>, vector<16x64xf32> -> vector<16x64xf32>
    %c0_20 = arith.constant 0 : index
    %c0_21 = arith.constant 0 : index
    %c0_22 = arith.constant 0 : index
    %35 = vector.load %arg7[%c0_20, %c0_21, %c0_22] : memref<1x64x64xbf16, #tpu.memory_space<vmem>>, vector<1x64x64xbf16>
    %36 = vector.shape_cast %35 : vector<1x64x64xbf16> to vector<64x64xbf16>
    %cst_23 = arith.constant dense<0.000000e+00> : vector<16x64xf32>
    %37 = tpu.matmul %28, %36, %cst_23 {dimension_numbers = #tpu.dot_dimension_numbers<[1], [0], [0], [1], [0, 0, 1, 1], [], []>} : vector<16x64xbf16>, vector<64x64xbf16>, vector<16x64xf32> -> vector<16x64xf32>
    %38 = vector.extract_strided_slice %31 {offsets = [0, 0], sizes = [16, 16], strides = [1, 1]} : vector<16x64xf32> to vector<16x16xf32>
    %39 = arith.truncf %38 : vector<16x16xf32> to vector<16x16xbf16>
    %40 = vector.extract_strided_slice %34 {offsets = [0, 0], sizes = [16, 16], strides = [1, 1]} : vector<16x64xf32> to vector<16x16xf32>
    %41 = arith.truncf %40 : vector<16x16xf32> to vector<16x16xbf16>
    %42 = vector.extract_strided_slice %37 {offsets = [0, 0], sizes = [16, 16], strides = [1, 1]} : vector<16x64xf32> to vector<16x16xf32>
    %43 = arith.truncf %42 : vector<16x16xf32> to vector<16x16xbf16>
    %cst_24 = arith.constant dense<0.000000e+00> : vector<16x16xf32>
    %44 = tpu.matmul %39, %41, %cst_24 {dimension_numbers = #tpu.dot_dimension_numbers<[1], [1], [0], [0], [0, 0, 1, 0], [], []>} : vector<16x16xbf16>, vector<16x16xbf16>, vector<16x16xf32> -> vector<16x16xf32>
    %cst_25 = arith.constant 2.500000e-01 : f32
    %45 = vector.broadcast %cst_25 : f32 to vector<16x16xf32>
    %46 = arith.mulf %44, %45 : vector<16x16xf32>
    %cst_26 = arith.constant dense<0xFF800000> : vector<16xf32>
    %47 = vector.multi_reduction <maximumf>, %46, %cst_26 [1] : vector<16x16xf32> to vector<16xf32>
    %48 = vector.shape_cast %47 : vector<16xf32> to vector<16x1xf32>
    %49 = vector.broadcast %48 : vector<16x1xf32> to vector<16x16xf32>
    %50 = arith.subf %46, %49 : vector<16x16xf32>
    %51 = math.exp %50 : vector<16x16xf32>
    %cst_27 = arith.constant dense<0.000000e+00> : vector<16xf32>
    %52 = vector.multi_reduction <add>, %51, %cst_27 [1] : vector<16x16xf32> to vector<16xf32>
    %53 = vector.shape_cast %52 : vector<16xf32> to vector<16x1xf32>
    %54 = tpu.reciprocal %53 {approx = true} : vector<16x1xf32> -> vector<16x1xf32>
    %55 = vector.broadcast %54 : vector<16x1xf32> to vector<16x16xf32>
    %56 = arith.mulf %51, %55 : vector<16x16xf32>
    %57 = arith.truncf %56 : vector<16x16xf32> to vector<16x16xbf16>
    %cst_28 = arith.constant dense<0.000000e+00> : vector<16x16xf32>
    %58 = tpu.matmul %57, %43, %cst_28 {dimension_numbers = #tpu.dot_dimension_numbers<[1], [0], [0], [1], [0, 0, 1, 1], [], []>} : vector<16x16xbf16>, vector<16x16xbf16>, vector<16x16xf32> -> vector<16x16xf32>
    %c0_29 = arith.constant 0 : index
    %c0_30 = arith.constant 0 : index
    %59 = vector.load %arg17[%c0_29, %c0_30] : memref<16x64xf32, #tpu.memory_space<vmem>>, vector<16x16xf32>
    tpu.vector_store %arg17[%c0_29, %c0_30], %58 {strides = array<i32>} : memref<16x64xf32, #tpu.memory_space<vmem>>, vector<16x16xf32>,
    %60 = vector.extract_strided_slice %31 {offsets = [0, 16], sizes = [16, 16], strides = [1, 1]} : vector<16x64xf32> to vector<16x16xf32>
    %61 = arith.truncf %60 : vector<16x16xf32> to vector<16x16xbf16>
    %62 = vector.extract_strided_slice %34 {offsets = [0, 16], sizes = [16, 16], strides = [1, 1]} : vector<16x64xf32> to vector<16x16xf32>
    %63 = arith.truncf %62 : vector<16x16xf32> to vector<16x16xbf16>
    %64 = vector.extract_strided_slice %37 {offsets = [0, 16], sizes = [16, 16], strides = [1, 1]} : vector<16x64xf32> to vector<16x16xf32>
    %65 = arith.truncf %64 : vector<16x16xf32> to vector<16x16xbf16>
    %cst_31 = arith.constant dense<0.000000e+00> : vector<16x16xf32>
    %66 = tpu.matmul %61, %63, %cst_31 {dimension_numbers = #tpu.dot_dimension_numbers<[1], [1], [0], [0], [0, 0, 1, 0], [], []>} : vector<16x16xbf16>, vector<16x16xbf16>, vector<16x16xf32> -> vector<16x16xf32>
    %cst_32 = arith.constant 2.500000e-01 : f32
    %67 = vector.broadcast %cst_32 : f32 to vector<16x16xf32>
    %68 = arith.mulf %66, %67 : vector<16x16xf32>
    %cst_33 = arith.constant dense<0xFF800000> : vector<16xf32>
    %69 = vector.multi_reduction <maximumf>, %68, %cst_33 [1] : vector<16x16xf32> to vector<16xf32>
    %70 = vector.shape_cast %69 : vector<16xf32> to vector<16x1xf32>
    %71 = vector.broadcast %70 : vector<16x1xf32> to vector<16x16xf32>
    %72 = arith.subf %68, %71 : vector<16x16xf32>
    %73 = math.exp %72 : vector<16x16xf32>
    %cst_34 = arith.constant dense<0.000000e+00> : vector<16xf32>
    %74 = vector.multi_reduction <add>, %73, %cst_34 [1] : vector<16x16xf32> to vector<16xf32>
    %75 = vector.shape_cast %74 : vector<16xf32> to vector<16x1xf32>
    %76 = tpu.reciprocal %75 {approx = true} : vector<16x1xf32> -> vector<16x1xf32>
    %77 = vector.broadcast %76 : vector<16x1xf32> to vector<16x16xf32>
    %78 = arith.mulf %73, %77 : vector<16x16xf32>
    %79 = arith.truncf %78 : vector<16x16xf32> to vector<16x16xbf16>
    %cst_35 = arith.constant dense<0.000000e+00> : vector<16x16xf32>
    %80 = tpu.matmul %79, %65, %cst_35 {dimension_numbers = #tpu.dot_dimension_numbers<[1], [0], [0], [1], [0, 0, 1, 1], [], []>} : vector<16x16xbf16>, vector<16x16xbf16>, vector<16x16xf32> -> vector<16x16xf32>
    %c0_36 = arith.constant 0 : index
    %c16 = arith.constant 16 : index
    %81 = vector.load %arg17[%c0_36, %c16] : memref<16x64xf32, #tpu.memory_space<vmem>>, vector<16x16xf32>
    tpu.vector_store %arg17[%c0_36, %c16], %80 {strides = array<i32>} : memref<16x64xf32, #tpu.memory_space<vmem>>, vector<16x16xf32>,
    %82 = vector.extract_strided_slice %31 {offsets = [0, 32], sizes = [16, 16], strides = [1, 1]} : vector<16x64xf32> to vector<16x16xf32>
    %83 = arith.truncf %82 : vector<16x16xf32> to vector<16x16xbf16>
    %84 = vector.extract_strided_slice %34 {offsets = [0, 32], sizes = [16, 16], strides = [1, 1]} : vector<16x64xf32> to vector<16x16xf32>
    %85 = arith.truncf %84 : vector<16x16xf32> to vector<16x16xbf16>
    %86 = vector.extract_strided_slice %37 {offsets = [0, 32], sizes = [16, 16], strides = [1, 1]} : vector<16x64xf32> to vector<16x16xf32>
    %87 = arith.truncf %86 : vector<16x16xf32> to vector<16x16xbf16>
    %cst_37 = arith.constant dense<0.000000e+00> : vector<16x16xf32>
    %88 = tpu.matmul %83, %85, %cst_37 {dimension_numbers = #tpu.dot_dimension_numbers<[1], [1], [0], [0], [0, 0, 1, 0], [], []>} : vector<16x16xbf16>, vector<16x16xbf16>, vector<16x16xf32> -> vector<16x16xf32>
    %cst_38 = arith.constant 2.500000e-01 : f32
    %89 = vector.broadcast %cst_38 : f32 to vector<16x16xf32>
    %90 = arith.mulf %88, %89 : vector<16x16xf32>
    %cst_39 = arith.constant dense<0xFF800000> : vector<16xf32>
    %91 = vector.multi_reduction <maximumf>, %90, %cst_39 [1] : vector<16x16xf32> to vector<16xf32>
    %92 = vector.shape_cast %91 : vector<16xf32> to vector<16x1xf32>
    %93 = vector.broadcast %92 : vector<16x1xf32> to vector<16x16xf32>
    %94 = arith.subf %90, %93 : vector<16x16xf32>
    %95 = math.exp %94 : vector<16x16xf32>
    %cst_40 = arith.constant dense<0.000000e+00> : vector<16xf32>
    %96 = vector.multi_reduction <add>, %95, %cst_40 [1] : vector<16x16xf32> to vector<16xf32>
    %97 = vector.shape_cast %96 : vector<16xf32> to vector<16x1xf32>
    %98 = tpu.reciprocal %97 {approx = true} : vector<16x1xf32> -> vector<16x1xf32>
    %99 = vector.broadcast %98 : vector<16x1xf32> to vector<16x16xf32>
    %100 = arith.mulf %95, %99 : vector<16x16xf32>
    %101 = arith.truncf %100 : vector<16x16xf32> to vector<16x16xbf16>
    %cst_41 = arith.constant dense<0.000000e+00> : vector<16x16xf32>
    %102 = tpu.matmul %101, %87, %cst_41 {dimension_numbers = #tpu.dot_dimension_numbers<[1], [0], [0], [1], [0, 0, 1, 1], [], []>} : vector<16x16xbf16>, vector<16x16xbf16>, vector<16x16xf32> -> vector<16x16xf32>
    %c0_42 = arith.constant 0 : index
    %c32 = arith.constant 32 : index
    %103 = vector.load %arg17[%c0_42, %c32] : memref<16x64xf32, #tpu.memory_space<vmem>>, vector<16x16xf32>
    tpu.vector_store %arg17[%c0_42, %c32], %102 {strides = array<i32>} : memref<16x64xf32, #tpu.memory_space<vmem>>, vector<16x16xf32>,
    %104 = vector.extract_strided_slice %31 {offsets = [0, 48], sizes = [16, 16], strides = [1, 1]} : vector<16x64xf32> to vector<16x16xf32>
    %105 = arith.truncf %104 : vector<16x16xf32> to vector<16x16xbf16>
    %106 = vector.extract_strided_slice %34 {offsets = [0, 48], sizes = [16, 16], strides = [1, 1]} : vector<16x64xf32> to vector<16x16xf32>
    %107 = arith.truncf %106 : vector<16x16xf32> to vector<16x16xbf16>
    %108 = vector.extract_strided_slice %37 {offsets = [0, 48], sizes = [16, 16], strides = [1, 1]} : vector<16x64xf32> to vector<16x16xf32>
    %109 = arith.truncf %108 : vector<16x16xf32> to vector<16x16xbf16>
    %cst_43 = arith.constant dense<0.000000e+00> : vector<16x16xf32>
    %110 = tpu.matmul %105, %107, %cst_43 {dimension_numbers = #tpu.dot_dimension_numbers<[1], [1], [0], [0], [0, 0, 1, 0], [], []>} : vector<16x16xbf16>, vector<16x16xbf16>, vector<16x16xf32> -> vector<16x16xf32>
    %cst_44 = arith.constant 2.500000e-01 : f32
    %111 = vector.broadcast %cst_44 : f32 to vector<16x16xf32>
    %112 = arith.mulf %110, %111 : vector<16x16xf32>
    %cst_45 = arith.constant dense<0xFF800000> : vector<16xf32>
    %113 = vector.multi_reduction <maximumf>, %112, %cst_45 [1] : vector<16x16xf32> to vector<16xf32>
    %114 = vector.shape_cast %113 : vector<16xf32> to vector<16x1xf32>
    %115 = vector.broadcast %114 : vector<16x1xf32> to vector<16x16xf32>
    %116 = arith.subf %112, %115 : vector<16x16xf32>
    %117 = math.exp %116 : vector<16x16xf32>
    %cst_46 = arith.constant dense<0.000000e+00> : vector<16xf32>
    %118 = vector.multi_reduction <add>, %117, %cst_46 [1] : vector<16x16xf32> to vector<16xf32>
    %119 = vector.shape_cast %118 : vector<16xf32> to vector<16x1xf32>
    %120 = tpu.reciprocal %119 {approx = true} : vector<16x1xf32> -> vector<16x1xf32>
    %121 = vector.broadcast %120 : vector<16x1xf32> to vector<16x16xf32>
    %122 = arith.mulf %117, %121 : vector<16x16xf32>
    %123 = arith.truncf %122 : vector<16x16xf32> to vector<16x16xbf16>
    %cst_47 = arith.constant dense<0.000000e+00> : vector<16x16xf32>
    %124 = tpu.matmul %123, %109, %cst_47 {dimension_numbers = #tpu.dot_dimension_numbers<[1], [0], [0], [1], [0, 0, 1, 1], [], []>} : vector<16x16xbf16>, vector<16x16xbf16>, vector<16x16xf32> -> vector<16x16xf32>
    %c0_48 = arith.constant 0 : index
    %c48 = arith.constant 48 : index
    %125 = vector.load %arg17[%c0_48, %c48] : memref<16x64xf32, #tpu.memory_space<vmem>>, vector<16x16xf32>
    tpu.vector_store %arg17[%c0_48, %c48], %124 {strides = array<i32>} : memref<16x64xf32, #tpu.memory_space<vmem>>, vector<16x16xf32>,
    %c0_49 = arith.constant 0 : index
    %c0_50 = arith.constant 0 : index
    %126 = vector.load %arg17[%c0_49, %c0_50] : memref<16x64xf32, #tpu.memory_space<vmem>>, vector<16x64xf32>
    %127 = arith.truncf %126 : vector<16x64xf32> to vector<16x64xbf16>
    %c0_51 = arith.constant 0 : index
    %c0_52 = arith.constant 0 : index
    %c0_53 = arith.constant 0 : index
    %128 = vector.load %arg8[%c0_51, %c0_52, %c0_53] : memref<1x64x64xbf16, #tpu.memory_space<vmem>>, vector<1x64x64xbf16>
    %129 = vector.shape_cast %128 : vector<1x64x64xbf16> to vector<64x64xbf16>
    %cst_54 = arith.constant dense<0.000000e+00> : vector<16x64xf32>
    %130 = tpu.matmul %127, %129, %cst_54 {dimension_numbers = #tpu.dot_dimension_numbers<[1], [0], [0], [1], [0, 0, 1, 1], [], []>} : vector<16x64xbf16>, vector<64x64xbf16>, vector<16x64xf32> -> vector<16x64xf32>
    %c0_55 = arith.constant 0 : index
    %c0_56 = arith.constant 0 : index
    %c0_57 = arith.constant 0 : index
    %131 = vector.load %arg9[%c0_55, %c0_56, %c0_57] : memref<1x1x64xf32, #tpu.memory_space<vmem>>, vector<1x1x64xf32>
    %132 = vector.shape_cast %131 : vector<1x1x64xf32> to vector<1x64xf32>
    %133 = vector.broadcast %132 : vector<1x64xf32> to vector<16x64xf32>
    %134 = arith.addf %130, %133 : vector<16x64xf32>
    %135 = arith.addf %3, %134 : vector<16x64xf32>
    %c0_58 = arith.constant 0 : index
    %c0_59 = arith.constant 0 : index
    %c0_60 = arith.constant 0 : index
    %136 = vector.load %arg10[%c0_58, %c0_59, %c0_60] : memref<1x1x64xf32, #tpu.memory_space<vmem>>, vector<1x1x64xf32>
    %137 = vector.shape_cast %136 : vector<1x1x64xf32> to vector<1x64xf32>
    %c0_61 = arith.constant 0 : index
    %c0_62 = arith.constant 0 : index
    %c0_63 = arith.constant 0 : index
    %138 = vector.load %arg11[%c0_61, %c0_62, %c0_63] : memref<1x1x64xf32, #tpu.memory_space<vmem>>, vector<1x1x64xf32>
    %139 = vector.shape_cast %138 : vector<1x1x64xf32> to vector<1x64xf32>
    %cst_64 = arith.constant dense<0.000000e+00> : vector<16xf32>
    %140 = vector.multi_reduction <add>, %135, %cst_64 [1] : vector<16x64xf32> to vector<16xf32>
    %141 = vector.shape_cast %140 : vector<16xf32> to vector<16x1xf32>
    %cst_65 = arith.constant 6.400000e+01 : f32
    %142 = vector.broadcast %cst_65 : f32 to vector<16x1xf32>
    %143 = arith.divf %141, %142 : vector<16x1xf32>
    %144 = vector.broadcast %143 : vector<16x1xf32> to vector<16x64xf32>
    %145 = arith.subf %135, %144 : vector<16x64xf32>
    %146 = arith.mulf %145, %145 : vector<16x64xf32>
    %cst_66 = arith.constant dense<0.000000e+00> : vector<16xf32>
    %147 = vector.multi_reduction <add>, %146, %cst_66 [1] : vector<16x64xf32> to vector<16xf32>
    %148 = vector.shape_cast %147 : vector<16xf32> to vector<16x1xf32>
    %cst_67 = arith.constant 6.400000e+01 : f32
    %149 = vector.broadcast %cst_67 : f32 to vector<16x1xf32>
    %150 = arith.divf %148, %149 : vector<16x1xf32>
    %cst_68 = arith.constant 9.99999974E-6 : f32
    %151 = vector.broadcast %cst_68 : f32 to vector<16x1xf32>
    %152 = arith.addf %150, %151 : vector<16x1xf32>
    %153 = math.rsqrt %152 : vector<16x1xf32>
    %154 = vector.broadcast %153 : vector<16x1xf32> to vector<16x64xf32>
    %155 = arith.mulf %145, %154 : vector<16x64xf32>
    %156 = vector.broadcast %137 : vector<1x64xf32> to vector<16x64xf32>
    %157 = arith.mulf %155, %156 : vector<16x64xf32>
    %158 = vector.broadcast %139 : vector<1x64xf32> to vector<16x64xf32>
    %159 = arith.addf %157, %158 : vector<16x64xf32>
    %160 = arith.truncf %159 : vector<16x64xf32> to vector<16x64xbf16>
    %c0_69 = arith.constant 0 : index
    %c0_70 = arith.constant 0 : index
    %c0_71 = arith.constant 0 : index
    %161 = vector.load %arg12[%c0_69, %c0_70, %c0_71] : memref<1x64x128xbf16, #tpu.memory_space<vmem>>, vector<1x64x128xbf16>
    %162 = vector.shape_cast %161 : vector<1x64x128xbf16> to vector<64x128xbf16>
    %cst_72 = arith.constant dense<0.000000e+00> : vector<16x128xf32>
    %163 = tpu.matmul %160, %162, %cst_72 {dimension_numbers = #tpu.dot_dimension_numbers<[1], [0], [0], [1], [0, 0, 1, 1], [], []>} : vector<16x64xbf16>, vector<64x128xbf16>, vector<16x128xf32> -> vector<16x128xf32>
    %c0_73 = arith.constant 0 : index
    %c0_74 = arith.constant 0 : index
    %c0_75 = arith.constant 0 : index
    %164 = vector.load %arg13[%c0_73, %c0_74, %c0_75] : memref<1x1x128xf32, #tpu.memory_space<vmem>>, vector<1x1x128xf32>
    %165 = vector.shape_cast %164 : vector<1x1x128xf32> to vector<1x128xf32>
    %166 = vector.broadcast %165 : vector<1x128xf32> to vector<16x128xf32>
    %167 = arith.addf %163, %166 : vector<16x128xf32>
    %168 = arith.mulf %167, %167 : vector<16x128xf32>
    %169 = arith.mulf %167, %168 : vector<16x128xf32>
    %cst_76 = arith.constant 4.471500e-02 : f32
    %170 = vector.broadcast %cst_76 : f32 to vector<16x128xf32>
    %171 = arith.mulf %170, %169 : vector<16x128xf32>
    %172 = arith.addf %167, %171 : vector<16x128xf32>
    %cst_77 = arith.constant 0.797884583 : f32
    %173 = vector.broadcast %cst_77 : f32 to vector<16x128xf32>
    %174 = arith.mulf %173, %172 : vector<16x128xf32>
    %175 = math.tanh %174 : vector<16x128xf32>
    %cst_78 = arith.constant 1.000000e+00 : f32
    %176 = vector.broadcast %cst_78 : f32 to vector<16x128xf32>
    %177 = arith.addf %176, %175 : vector<16x128xf32>
    %cst_79 = arith.constant 5.000000e-01 : f32
    %178 = vector.broadcast %cst_79 : f32 to vector<16x128xf32>
    %179 = arith.mulf %178, %177 : vector<16x128xf32>
    %180 = arith.mulf %167, %179 : vector<16x128xf32>
    %181 = arith.truncf %180 : vector<16x128xf32> to vector<16x128xbf16>
    %c0_80 = arith.constant 0 : index
    %c0_81 = arith.constant 0 : index
    %c0_82 = arith.constant 0 : index
    %182 = vector.load %arg14[%c0_80, %c0_81, %c0_82] : memref<1x128x64xbf16, #tpu.memory_space<vmem>>, vector<1x128x64xbf16>
    %183 = vector.shape_cast %182 : vector<1x128x64xbf16> to vector<128x64xbf16>
    %cst_83 = arith.constant dense<0.000000e+00> : vector<16x64xf32>
    %184 = tpu.matmul %181, %183, %cst_83 {dimension_numbers = #tpu.dot_dimension_numbers<[1], [0], [0], [1], [0, 0, 1, 1], [], []>} : vector<16x128xbf16>, vector<128x64xbf16>, vector<16x64xf32> -> vector<16x64xf32>
    %c0_84 = arith.constant 0 : index
    %c0_85 = arith.constant 0 : index
    %c0_86 = arith.constant 0 : index
    %185 = vector.load %arg15[%c0_84, %c0_85, %c0_86] : memref<1x1x64xf32, #tpu.memory_space<vmem>>, vector<1x1x64xf32>
    %186 = vector.shape_cast %185 : vector<1x1x64xf32> to vector<1x64xf32>
    %187 = vector.broadcast %186 : vector<1x64xf32> to vector<16x64xf32>
    %188 = arith.addf %184, %187 : vector<16x64xf32>
    %189 = arith.addf %159, %188 : vector<16x64xf32>
    %c0_87 = arith.constant 0 : index
    %c0_88 = arith.constant 0 : index
    %190 = vector.load %arg16[%c0_87, %c0_88] : memref<16x64xf32, #tpu.memory_space<vmem>>, vector<16x64xf32>
    tpu.vector_store %arg16[%c0_87, %c0_88], %189 {strides = array<i32>} : memref<16x64xf32, #tpu.memory_space<vmem>>, vector<16x64xf32>,
    return
  }
  func.func @transform_0(%arg0: i32, %arg1: i32) -> (i32, i32) {
    %c0_i32 = arith.constant 0 : i32
    %c0_i32_0 = arith.constant 0 : i32
    return %arg0, %c0_i32 : i32, i32
  }
  func.func @transform_1(%arg0: i32, %arg1: i32) -> (i32, i32, i32) {
    %c0_i32 = arith.constant 0 : i32
    %c0_i32_0 = arith.constant 0 : i32
    %c0_i32_1 = arith.constant 0 : i32
    return %arg1, %c0_i32, %c0_i32_0 : i32, i32, i32
  }
  func.func @transform_2(%arg0: i32, %arg1: i32) -> (i32, i32, i32) {
    %c0_i32 = arith.constant 0 : i32
    %c0_i32_0 = arith.constant 0 : i32
    %c0_i32_1 = arith.constant 0 : i32
    return %arg1, %c0_i32, %c0_i32_0 : i32, i32, i32
  }
  func.func @transform_3(%arg0: i32, %arg1: i32) -> (i32, i32, i32) {
    %c0_i32 = arith.constant 0 : i32
    %c0_i32_0 = arith.constant 0 : i32
    %c0_i32_1 = arith.constant 0 : i32
    return %arg1, %c0_i32, %c0_i32_0 : i32, i32, i32
  }
  func.func @transform_4(%arg0: i32, %arg1: i32) -> (i32, i32, i32) {
    %c0_i32 = arith.constant 0 : i32
    %c0_i32_0 = arith.constant 0 : i32
    %c0_i32_1 = arith.constant 0 : i32
    return %arg1, %c0_i32, %c0_i32_0 : i32, i32, i32
  }
  func.func @transform_5(%arg0: i32, %arg1: i32) -> (i32, i32, i32) {
    %c0_i32 = arith.constant 0 : i32
    %c0_i32_0 = arith.constant 0 : i32
    %c0_i32_1 = arith.constant 0 : i32
    return %arg1, %c0_i32, %c0_i32_0 : i32, i32, i32
  }
  func.func @transform_6(%arg0: i32, %arg1: i32) -> (i32, i32, i32) {
    %c0_i32 = arith.constant 0 : i32
    %c0_i32_0 = arith.constant 0 : i32
    %c0_i32_1 = arith.constant 0 : i32
    return %arg1, %c0_i32, %c0_i32_0 : i32, i32, i32
  }
  func.func @transform_7(%arg0: i32, %arg1: i32) -> (i32, i32, i32) {
    %c0_i32 = arith.constant 0 : i32
    %c0_i32_0 = arith.constant 0 : i32
    %c0_i32_1 = arith.constant 0 : i32
    return %arg1, %c0_i32, %c0_i32_0 : i32, i32, i32
  }
  func.func @transform_8(%arg0: i32, %arg1: i32) -> (i32, i32, i32) {
    %c0_i32 = arith.constant 0 : i32
    %c0_i32_0 = arith.constant 0 : i32
    %c0_i32_1 = arith.constant 0 : i32
    return %arg1, %c0_i32, %c0_i32_0 : i32, i32, i32
  }
  func.func @transform_9(%arg0: i32, %arg1: i32) -> (i32, i32, i32) {
    %c0_i32 = arith.constant 0 : i32
    %c0_i32_0 = arith.constant 0 : i32
    %c0_i32_1 = arith.constant 0 : i32
    return %arg1, %c0_i32, %c0_i32_0 : i32, i32, i32
  }
  func.func @transform_10(%arg0: i32, %arg1: i32) -> (i32, i32, i32) {
    %c0_i32 = arith.constant 0 : i32
    %c0_i32_0 = arith.constant 0 : i32
    %c0_i32_1 = arith.constant 0 : i32
    return %arg1, %c0_i32, %c0_i32_0 : i32, i32, i32
  }
  func.func @transform_11(%arg0: i32, %arg1: i32) -> (i32, i32, i32) {
    %c0_i32 = arith.constant 0 : i32
    %c0_i32_0 = arith.constant 0 : i32
    %c0_i32_1 = arith.constant 0 : i32
    return %arg1, %c0_i32, %c0_i32_0 : i32, i32, i32
  }
  func.func @transform_12(%arg0: i32, %arg1: i32) -> (i32, i32, i32) {
    %c0_i32 = arith.constant 0 : i32
    %c0_i32_0 = arith.constant 0 : i32
    %c0_i32_1 = arith.constant 0 : i32
    return %arg1, %c0_i32, %c0_i32_0 : i32, i32, i32
  }
  func.func @transform_13(%arg0: i32, %arg1: i32) -> (i32, i32, i32) {
    %c0_i32 = arith.constant 0 : i32
    %c0_i32_0 = arith.constant 0 : i32
    %c0_i32_1 = arith.constant 0 : i32
    return %arg1, %c0_i32, %c0_i32_0 : i32, i32, i32
  }
  func.func @transform_14(%arg0: i32, %arg1: i32) -> (i32, i32) {
    %c0_i32 = arith.constant 0 : i32
    %c0_i32_0 = arith.constant 0 : i32
    return %arg0, %c0_i32 : i32, i32
  }
}

</mosaic_0001>

<bundles_post_ra>
// kernel: cdcl_forward.3
= control target key start
LH: loop header
LB: loop body
LE: loop exit
PB: predicated region body
PF: predicated region fallthrough
CT: control target
= control target key end

     0   :  { %vm301_vm0 = vcmask 523264   ;;  %s657_s1 = inlined_call_operand.vmem [shape: bf16[256,64], index: 1, kind: input, shape index: {}]   ;;  %s658_s0 = inlined_call_operand.vmem [shape: f32[128,256], index: 0, kind: input, shape index: {}]   ;;  %s659_s2 = inlined_call_operand.vmem [shape: f32[128,64], index: 2, kind: output, shape index: {}]  }
   0x1   :  { %v418_v0 = vld [vmem:[%s657_s1 + $0x40] sm:$0xff]   ;;  %v420_v2 = vld [vmem:[%s657_s1 + $0x48] sm:$0xff]   ;;  %v422_v4 = vld [vmem:[%s657_s1 + $0x50] sm:$0xff]  }
   0x2   :  { %v419_v1 = vld [vmem:[%s657_s1] sm:$0xff]   ;;  %338 = vmatprep.subr.bf16.mxu0 %v418_v0  ;;  %402 = vmatprep.subr.bf16.mxu1 %v418_v0  ;;  %v421_v3 = vld [vmem:[%s657_s1 + $0x8] sm:$0xff]   ;;  %v423_v5 = vld [vmem:[%s657_s1 + $0x10] sm:$0xff]  }
   0x3   :  { %339 = vmatpush3.bf16.msra.mxu0 %v419_v1  ;;  %410 = vmatpush3.bf16.msra.mxu1 %v419_v1  ;;  %v424_v6 = vld [vmem:[%s657_s1 + $0x58] sm:$0xff]   ;;  %v426_v8 = vld [vmem:[%s657_s1 + $0x60] sm:$0xff]   ;;  %v428_v10 = vld [vmem:[%s657_s1 + $0x68] sm:$0xff]  }
   0x4   :  { %340 = vmatprep.subr.bf16.mxu0 %v420_v2  ;;  %403 = vmatprep.subr.bf16.mxu1 %v420_v2  ;;  %v425_v7 = vld [vmem:[%s657_s1 + $0x18] sm:$0xff]   ;;  %v427_v9 = vld [vmem:[%s657_s1 + $0x20] sm:$0xff]   ;;  %v13_v11 = vld [vmem:[%s658_s0 + $0x8] sm:$0xff] }
   0x5   :  { %v15_v12 = vld [vmem:[%s658_s0 + $0x18] sm:$0xff]  ;;  %v29_v13 = vld [vmem:[%s658_s0 + $0x88] sm:$0xff]  ;;  %v430_v18 = vld [vmem:[%s657_s1 + $0x70] sm:$0xff]  }
   0x6   :  { %v45_v14 = vpack.c.bf16 %v15_v12, %v13_v11  ;;  %v31_v15 = vld [vmem:[%s658_s0 + $0x98] sm:$0xff]  ;;  %v429_v17 = vld [vmem:[%s657_s1 + $0x28] sm:$0xff]   ;;  %v431_v19 = vld [vmem:[%s657_s1 + $0x30] sm:$0xff]  }
   0x7   :  { %341 = vmatpush3.bf16.msra.mxu0 %v421_v3  ;;  %411 = vmatpush3.bf16.msra.mxu1 %v421_v3  ;;  %v53_v16 = vpack.c.bf16 %v31_v15, %v29_v13  ;;  %v432_v20 = vld [vmem:[%s657_s1 + $0x78] sm:$0xff]   ;;  %v12_v22 = vld [vmem:[%s658_s0] sm:$0xff]  ;;  %v14_v23 = vld [vmem:[%s658_s0 + $0x10] sm:$0xff] }
   0x8   :  { %342 = vmatprep.subr.bf16.mxu0 %v422_v4  ;;  %404 = vmatprep.subr.bf16.mxu1 %v422_v4  ;;  %v433_v21 = vld [vmem:[%s657_s1 + $0x38] sm:$0xff]   ;;  %v28_v24 = vld [vmem:[%s658_s0 + $0x80] sm:$0xff]  ;;  %v30_v25 = vld [vmem:[%s658_s0 + $0x90] sm:$0xff]  ;;  %v44_v30 = vpack.c.bf16 %v14_v23, %v12_v22 }
   0x9   :  { %220 = vmatprep.mubr.bf16.mxu0 %v45_v14  ;;  %252 = vmatprep.mubr.bf16.mxu1 %v53_v16  ;;  %v17_v26 = vld [vmem:[%s658_s0 + $0x28] sm:$0xff]  ;;  %v19_v27 = vld [vmem:[%s658_s0 + $0x38] sm:$0xff]  ;;  %v52_v31 = vpack.c.bf16 %v30_v25, %v28_v24  ;;  %v16_v34 = vld [vmem:[%s658_s0 + $0x20] sm:$0xff] }
   0xa   :  { %v33_v28 = vld [vmem:[%s658_s0 + $0xa8] sm:$0xff]  ;;  %v35_v29 = vld [vmem:[%s658_s0 + $0xb8] sm:$0xff]  ;;  %v47_v32 = vpack.c.bf16 %v19_v27, %v17_v26  ;;  %v18_v35 = vld [vmem:[%s658_s0 + $0x30] sm:$0xff] }
   0xb   :  { %343 = vmatpush3.bf16.msra.mxu0 %v423_v5  ;;  %412 = vmatpush3.bf16.msra.mxu1 %v423_v5  ;;  %v55_v33 = vpack.c.bf16 %v35_v29, %v33_v28  ;;  %v32_v36 = vld [vmem:[%s658_s0 + $0xa0] sm:$0xff]  ;;  %v34_v37 = vld [vmem:[%s658_s0 + $0xb0] sm:$0xff]  ;;  %v21_v38 = vld [vmem:[%s658_s0 + $0x48] sm:$0xff]  ;;  %v46_v42 = vpack.c.bf16 %v18_v35, %v16_v34 }
   0xc   :  { %344 = vmatprep.subr.bf16.mxu0 %v424_v6  ;;  %405 = vmatprep.subr.bf16.mxu1 %v424_v6  ;;  %v23_v39 = vld [vmem:[%s658_s0 + $0x58] sm:$0xff]  ;;  %v37_v40 = vld [vmem:[%s658_s0 + $0xc8] sm:$0xff]  ;;  %v54_v43 = vpack.c.bf16 %v34_v37, %v32_v36  ;;  %v20_v46 = vld [vmem:[%s658_s0 + $0x40] sm:$0xff] }
   0xd   :  { %v39_v41 = vld [vmem:[%s658_s0 + $0xd8] sm:$0xff]  ;;  %v49_v44 = vpack.c.bf16 %v23_v39, %v21_v38  ;;  %v22_v47 = vld [vmem:[%s658_s0 + $0x50] sm:$0xff]  ;;  %v36_v48 = vld [vmem:[%s658_s0 + $0xc0] sm:$0xff] }
   0xe   :  { %v57_v45 = vpack.c.bf16 %v39_v41, %v37_v40  ;;  %v38_v49 = vld [vmem:[%s658_s0 + $0xd0] sm:$0xff]  ;;  %v25_v50 = vld [vmem:[%s658_s0 + $0x68] sm:$0xff]  ;;  %v27_v51 = vld [vmem:[%s658_s0 + $0x78] sm:$0xff]  ;;  %v48_v54 = vpack.c.bf16 %v22_v47, %v20_v46 }
   0xf   :  { %345 = vmatpush3.bf16.msra.mxu0 %v425_v7  ;;  %413 = vmatpush3.bf16.msra.mxu1 %v425_v7  ;;  %v41_v52 = vld [vmem:[%s658_s0 + $0xe8] sm:$0xff]  ;;  %v43_v53 = vld [vmem:[%s658_s0 + $0xf8] sm:$0xff]  ;;  %v56_v55 = vpack.c.bf16 %v38_v49, %v36_v48  ;;  %v51_v56 = vpack.c.bf16 %v27_v51, %v25_v50  ;;  %v24_v58 = vld [vmem:[%s658_s0 + $0x60] sm:$0xff] }
  0x10   :  { %346 = vmatprep.subr.bf16.mxu0 %v426_v8  ;;  %406 = vmatprep.subr.bf16.mxu1 %v426_v8  ;;  %v59_v57 = vpack.c.bf16 %v43_v53, %v41_v52  ;;  %v26_v59 = vld [vmem:[%s658_s0 + $0x70] sm:$0xff]  ;;  %v40_v60 = vld [vmem:[%s658_s0 + $0xe0] sm:$0xff] }
  0x11   :  { %v42_v61 = vld [vmem:[%s658_s0 + $0xf0] sm:$0xff]  ;;  %v50_v62 = vpack.c.bf16 %v26_v59, %v24_v58 }
  0x12   :  { %v58_v63 = vpack.c.bf16 %v42_v61, %v40_v60 }
  0x13   :  { %347 = vmatpush3.bf16.msra.mxu0 %v427_v9  ;;  %414 = vmatpush3.bf16.msra.mxu1 %v427_v9 }
  0x14   :  { %348 = vmatprep.subr.bf16.mxu0 %v428_v10  ;;  %407 = vmatprep.subr.bf16.mxu1 %v428_v10 }
  0x17   :  { %349 = vmatpush3.bf16.msra.mxu0 %v429_v17  ;;  %415 = vmatpush3.bf16.msra.mxu1 %v429_v17 }
  0x18   :  { %350 = vmatprep.subr.bf16.mxu0 %v430_v18  ;;  %408 = vmatprep.subr.bf16.mxu1 %v430_v18 }
  0x1b   :  { %351 = vmatpush3.bf16.msra.mxu0 %v431_v19  ;;  %416 = vmatpush3.bf16.msra.mxu1 %v431_v19 }
  0x1c   :  { %352 = vmatprep.subr.bf16.mxu0 %v432_v20  ;;  %409 = vmatprep.subr.bf16.mxu1 %v432_v20 }
  0x1f   :  { %353 = vmatpush3.bf16.msra.mxu0 %v433_v21  ;;  %417 = vmatpush3.bf16.msra.mxu1 %v433_v21 }
  0x22   :  { %221 = vmatmul.mubr.bf16.vlgmr.msra.gmra.mrb[0].mxu0 %v44_v30  ;;  %253 = vmatmul.mubr.bf16.vlgmr.msra.gmra.mrb[0].mxu1 %v52_v31 }
  0x23   :  { %228 = vmatprep.mubr.bf16.mxu0 %v47_v32  ;;  %260 = vmatprep.mubr.bf16.mxu1 %v55_v33 }
  0x2a   :  { %229 = vmatmul.mubr.bf16.gmra.mrb[4].mxu0 %v46_v42  ;;  %261 = vmatmul.mubr.bf16.gmra.mrb[4].mxu1 %v54_v43 }
  0x2b   :  { %236 = vmatprep.mubr.bf16.mxu0 %v49_v44  ;;  %268 = vmatprep.mubr.bf16.mxu1 %v57_v45 }
  0x32   :  { %237 = vmatmul.mubr.bf16.gmra.mrb[8].mxu0 %v48_v54  ;;  %269 = vmatmul.mubr.bf16.gmra.mrb[8].mxu1 %v56_v55 }
  0x33   :  { %244 = vmatprep.mubr.bf16.mxu0 %v51_v56  ;;  %276 = vmatprep.mubr.bf16.mxu1 %v59_v57 }
  0x3a   :  { %245 = vmatmul.mubr.bf16.gmra.mrb[12].mxu0 %v50_v62  ;;  %277 = vmatmul.mubr.bf16.gmra.mrb[12].mxu1 %v58_v63 }
  0xf5   :  { %v354_v0 = vpop.f32.mrb[0].mxu0  ;;  %v378_v1 = vpop.f32.mrb[0].mxu1 }
  0xf6   :  { %v355_v2 = vpop.f32.mrb[1].mxu0  ;;  %v379_v3 = vpop.f32.mrb[1].mxu1 }
  0xf7   :  { %v356_v4 = vadd.f32 %v355_v2, %v354_v0  ;;  %v380_v5 = vadd.f32 %v379_v3, %v378_v1  ;;  %v357_v6 = vpop.f32.mrb[2].mxu0  ;;  %v381_v7 = vpop.f32.mrb[2].mxu1 }
  0xf8   :  { %v358_v8 = vpop.f32.mrb[3].mxu0  ;;  %v382_v9 = vpop.f32.mrb[3].mxu1 }
  0xf9   :  { %v285_v10 = vmax.f32 %v356_v4, 0.0  ;;  %v293_v11 = vmax.f32 %v380_v5, 0.0  ;;  %v359_v12 = vadd.f32 %v358_v8, %v357_v6  ;;  %v383_v13 = vadd.f32 %v382_v9, %v381_v7 }
  0xfb   :  { %302 = vst.msk [vmem:[%s659_s2] sm:$0xff] %vm301_vm0, %v285_v10  ;;  %310 = vst.msk [vmem:[%s659_s2 + $0x40] sm:$0xff] %vm301_vm0, %v293_v11  ;;  %v286_v14 = vmax.f32 %v359_v12, 0.0  ;;  %v294_v15 = vmax.f32 %v383_v13, 0.0 }
  0xfd   :  { %303 = vst.msk [vmem:[%s659_s2 + $0x8] sm:$0xff] %vm301_vm0, %v286_v14  ;;  %311 = vst.msk [vmem:[%s659_s2 + $0x48] sm:$0xff] %vm301_vm0, %v294_v15  ;;  %v360_v16 = vpop.f32.mrb[4].mxu0  ;;  %v384_v17 = vpop.f32.mrb[4].mxu1 }
  0xfe   :  { %v361_v18 = vpop.f32.mrb[5].mxu0  ;;  %v385_v19 = vpop.f32.mrb[5].mxu1 }
  0xff   :  { %v362_v20 = vadd.f32 %v361_v18, %v360_v16  ;;  %v386_v21 = vadd.f32 %v385_v19, %v384_v17  ;;  %v363_v22 = vpop.f32.mrb[6].mxu0  ;;  %v387_v23 = vpop.f32.mrb[6].mxu1 }
 0x100   :  { %v364_v24 = vpop.f32.mrb[7].mxu0  ;;  %v388_v25 = vpop.f32.mrb[7].mxu1 }
 0x101   :  { %v287_v26 = vmax.f32 %v362_v20, 0.0  ;;  %v295_v27 = vmax.f32 %v386_v21, 0.0  ;;  %v365_v28 = vadd.f32 %v364_v24, %v363_v22  ;;  %v389_v29 = vadd.f32 %v388_v25, %v387_v23 }
 0x103   :  { %304 = vst.msk [vmem:[%s659_s2 + $0x10] sm:$0xff] %vm301_vm0, %v287_v26  ;;  %312 = vst.msk [vmem:[%s659_s2 + $0x50] sm:$0xff] %vm301_vm0, %v295_v27  ;;  %v288_v30 = vmax.f32 %v365_v28, 0.0  ;;  %v296_v31 = vmax.f32 %v389_v29, 0.0 }
 0x105   :  { %305 = vst.msk [vmem:[%s659_s2 + $0x18] sm:$0xff] %vm301_vm0, %v288_v30  ;;  %313 = vst.msk [vmem:[%s659_s2 + $0x58] sm:$0xff] %vm301_vm0, %v296_v31  ;;  %v366_v32 = vpop.f32.mrb[8].mxu0  ;;  %v390_v33 = vpop.f32.mrb[8].mxu1 }
 0x106   :  { %v367_v34 = vpop.f32.mrb[9].mxu0  ;;  %v391_v35 = vpop.f32.mrb[9].mxu1 }
 0x107   :  { %v368_v36 = vadd.f32 %v367_v34, %v366_v32  ;;  %v392_v37 = vadd.f32 %v391_v35, %v390_v33  ;;  %v369_v38 = vpop.f32.mrb[10].mxu0  ;;  %v393_v39 = vpop.f32.mrb[10].mxu1 }
 0x108   :  { %v370_v40 = vpop.f32.mrb[11].mxu0  ;;  %v394_v41 = vpop.f32.mrb[11].mxu1 }
 0x109   :  { %v289_v42 = vmax.f32 %v368_v36, 0.0  ;;  %v297_v43 = vmax.f32 %v392_v37, 0.0  ;;  %v371_v44 = vadd.f32 %v370_v40, %v369_v38  ;;  %v395_v45 = vadd.f32 %v394_v41, %v393_v39 }
 0x10b   :  { %306 = vst.msk [vmem:[%s659_s2 + $0x20] sm:$0xff] %vm301_vm0, %v289_v42  ;;  %314 = vst.msk [vmem:[%s659_s2 + $0x60] sm:$0xff] %vm301_vm0, %v297_v43  ;;  %v290_v46 = vmax.f32 %v371_v44, 0.0  ;;  %v298_v47 = vmax.f32 %v395_v45, 0.0 }
 0x10d   :  { %307 = vst.msk [vmem:[%s659_s2 + $0x28] sm:$0xff] %vm301_vm0, %v290_v46  ;;  %315 = vst.msk [vmem:[%s659_s2 + $0x68] sm:$0xff] %vm301_vm0, %v298_v47  ;;  %v372_v48 = vpop.f32.mrb[12].mxu0  ;;  %v396_v49 = vpop.f32.mrb[12].mxu1 }
 0x10e   :  { %v373_v50 = vpop.f32.mrb[13].mxu0  ;;  %v397_v51 = vpop.f32.mrb[13].mxu1 }
 0x10f   :  { %v374_v52 = vadd.f32 %v373_v50, %v372_v48  ;;  %v398_v53 = vadd.f32 %v397_v51, %v396_v49  ;;  %v375_v54 = vpop.f32.mrb[14].mxu0  ;;  %v399_v55 = vpop.f32.mrb[14].mxu1 }
 0x110   :  { %v376_v56 = vpop.f32.mrb[15].mxu0  ;;  %v400_v57 = vpop.f32.mrb[15].mxu1 }
 0x111   :  { %v291_v58 = vmax.f32 %v374_v52, 0.0  ;;  %v299_v59 = vmax.f32 %v398_v53, 0.0  ;;  %v377_v60 = vadd.f32 %v376_v56, %v375_v54  ;;  %v401_v61 = vadd.f32 %v400_v57, %v399_v55 }
 0x113   :  { %308 = vst.msk [vmem:[%s659_s2 + $0x30] sm:$0xff] %vm301_vm0, %v291_v58  ;;  %316 = vst.msk [vmem:[%s659_s2 + $0x70] sm:$0xff] %vm301_vm0, %v299_v59  ;;  %v292_v62 = vmax.f32 %v377_v60, 0.0  ;;  %v300_v63 = vmax.f32 %v401_v61, 0.0 }
 0x115   :  { %309 = vst.msk [vmem:[%s659_s2 + $0x38] sm:$0xff] %vm301_vm0, %v292_v62  ;;  %317 = vst.msk [vmem:[%s659_s2 + $0x78] sm:$0xff] %vm301_vm0, %v300_v63 }

// kernel: cdcl_forward.5
= control target key start
LH: loop header
LB: loop body
LE: loop exit
PB: predicated region body
PF: predicated region fallthrough
CT: control target
= control target key end

     0   :  { %s1357_s0 = inlined_call_operand.vmem [shape: f32[2,16,64], index: 0, kind: input, shape index: {}]   ;;  %s1358_s1 = inlined_call_operand.vmem [shape: f32[1,64], index: 1, kind: input, shape index: {}]   ;;  %s1359_s2 = inlined_call_operand.vmem [shape: f32[1,64], index: 2, kind: input, shape index: {}]   ;;  %s1360_s3 = inlined_call_operand.vmem [shape: f32[1,64], index: 3, kind: input, shape index: {}]   ;;  %s1361_s4 = inlined_call_operand.<no memory space> [shape: f32[1,1], index: 4, kind: input, shape index: {}]   ;;  %s1362_s5 = inlined_call_operand.vmem [shape: f32[64,10], index: 5, kind: input, shape index: {}]   ;;  %s1363_s6 = inlined_call_operand.vmem [shape: f32[1,10], index: 6, kind: input, shape index: {}]   ;;  %s1364_s7 = inlined_call_operand.hbm [shape: f32[2,1,10], index: 7, kind: output, shape index: {0}]   ;;  %s1365_s8 = inlined_call_operand.hbm [shape: f32[2,1,16], index: 8, kind: output, shape index: {1}]   ;;  %s1366_s9 = inlined_call_operand.hbm [shape: f32[2,1,64], index: 9, kind: output, shape index: {2}]  }
   0x1   :  { %1368 = sst [smem:[#allocation10_spill]] %s1357_s0  ;;  %v15_v0 = vstv %s1361_s4 }
   0x2   :  { %16 = vst [vmem:[#allocation2] sm:$0x1] %v15_v0 }
   0x3   :  { %17 = vsyncpa [#allocation4], 0 }
   0x4   :  { %19 = vsyncpa [#allocation4 + $0x1], 0 }
   0x5   :  { %20 = vsyncpa [#allocation6], 0 }
   0x6   :  { %22 = vsyncpa [#allocation6 + $0x1], 0  ;;  %s1138_s11 = smov 0   ;;  %s1140_s12 = smov 0  }
   0x7   :  { %s1142_s13 = smov 0   ;;  %s1144_s14 = smov 0  }
   0x8 LB: > { %s1159_s4 = sadd.s32 4294967295, %s1077_s14   ;;  %s1367_s15 = sadd.s32 4294967294, %s1077_s14   ;;  %s1077_s14 = sphi %s1144_s14, %s1376_s14   ;;  %s1073_s13 = sphi %s1142_s13, %s1375_s13   ;;  %s1069_s12 = sphi %s1140_s12, %s1374_s12   ;;  %s1065_s11 = sphi %s1138_s11, %s1373_s11  }
   0x9   : > { %s1163_s16 = sadd.s32 1, %s1077_s14   ;;  %s187_s17 = sadd.s32 1, %s1073_s13 }
   0xa   : > { %s184_s18 = ssub.s32 %s1077_s14, %s1163_s16  ;;  %p197_p0 = scmp.ne.s32.totalorder %s1073_s13, %s1069_s12 }
   0xb   : > { %p185_p1 = scmp.eq.s32.totalorder %s184_s18, 0  ;;  %p198_p2 = scmp.eq.s32.totalorder %s1159_s4, 1 }
   0xc   : > { %p203_p3 = scmp.ne.s32.totalorder %s1069_s12, %s1065_s11  ;;  %p204_p4 = scmp.eq.s32.totalorder %s1367_s15, 1 }
   0xd   : > { %s1176_s19 = scalar_select %p185_p1, %s1073_s13, %s187_s17  }
   0xe   : > { %p1178_p5 = por %p198_p2, %p197_p0  ;;  %p1182_p6 = por %p204_p4, %p203_p3 }
   0xf   : > { %p810_p7 = scmp.ge.s32.totalorder %s1077_s14, 1  ;;  %p300_p8 = scmp.lt.s32.totalorder %s1077_s14, 3 }
  0x11   : > { %p301_p9 = pnand %p810_p7, %p300_p8 }
  0x12   : > { %p343_p10 = scmp.lt.s32.totalorder (!%p301_p9), %s1159_s4, 1  ;;  %vm350_vm0 = vcmask (!%p301_p9), 523264   ;;  %s1371_s0 = sld [smem:[#allocation10_spill]] (!%p301_p9)  ;;  %v1079_v15 = vmov (!%p301_p9), 0.0|0.0   ;;  %vm1080_vm1 = vmmov (!%p301_p9), 0   ;;  %v1081_v16 = vmov (!%p301_p9), 0.0  }
  0x13   : > { %304 = sbr.rel (%p301_p9) target bundleno = 1325 (0x52d), region = 48  ;;  %874 = vmatprep.subr.bf16.mxu0 (!%p301_p9), %v1079_v15  ;;  %881 = vmatprep.subr.bf16.mxu1 (!%p301_p9), %v1079_v15  ;;  %v397_v17 = vld [vmem:[#allocation2] sm:$0x1] (!%p301_p9)  ;;  %vm876_vm2 = vmpackc.low (!%p301_p9), %vm350_vm0, %vm350_vm0  ;;  %vm479_vm3 = vcmask (!%p301_p9), 122880   ;;  %v566_v47 = vld [vmem:[%s1362_s5 + $0x8] sm:$0xff] (!%p301_p9)  ;;  %vm491_vm4 = vcmask (!%p301_p9), 130048  }
  0x14   : > { %845 = vmatprep.mubr.msk.f32.mxu0 (!%p301_p9), %vm1080_vm1, %v1081_v16  ;;  %871 = vmatprep.mubr.msk.f32.mxu1 (!%p301_p9), %vm1080_vm1, %v1081_v16  ;;  %893 = vpush (!%p301_p9), %v397_v17  ;;  %v813_v26 = vld [vmem:[%s1358_s1] ss:$0 sm:$0xff] (!%p301_p9)  ;;  %v567_v48 = vld [vmem:[%s1362_s5 + $0x10] sm:$0xff] (!%p301_p9)  ;;  %v568_v50 = vld [vmem:[%s1362_s5 + $0x18] sm:$0xff] (!%p301_p9)  ;;  %vm650_vm5 = vcmask (!%p301_p9), 516096   ;;  %s656_s30 = sand.u32 (!%p301_p9), 1, %s1159_s4  }
  0x15   : > { %v814_v30 = vld [vmem:[%s1359_s2] ss:$0 sm:$0xff] (!%p301_p9)  ;;  %v885_v51 = vpack.c.bf16 (!%p301_p9), %v568_v50, %v567_v48  ;;  %v570_v53 = vld [vmem:[%s1362_s5 + $0x28] sm:$0xff] (!%p301_p9)  ;;  %v571_v55 = vld [vmem:[%s1362_s5 + $0x30] sm:$0xff] (!%p301_p9)  ;;  %s1253_s10 = sshll.u32 (!%p301_p9), %s1159_s4, 4  ;;  %s1263_s24 = scalar_lea.sflag (!%p301_p9), [#allocation6], %s656_s30 }
  0x16   : > { %v396_v35 = vld [vmem:[%s1360_s3] sm:$0x1] (!%p301_p9)  ;;  %v572_v56 = vld [vmem:[%s1362_s5 + $0x38] sm:$0xff] (!%p301_p9) }
  0x17   : > { %v565_v46 = vld [vmem:[%s1362_s5] sm:$0xff] (!%p301_p9)  ;;  %v891_v57 = vpack.c.bf16 (!%p301_p9), %v572_v56, %v571_v55 }
  0x18   : > { %v882_v49 = vpack.c.bf16 (!%p301_p9), %v566_v47, %v565_v46  ;;  %v569_v52 = vld [vmem:[%s1362_s5 + $0x20] sm:$0xff] (!%p301_p9) }
  0x19   : > { %v888_v54 = vpack.c.bf16 (!%p301_p9), %v570_v53, %v569_v52 }
  0x1a   : > { %s344_s22 = scalar_select %p343_p10, %s1159_s4, 1  ;;  %883 = vmatpush3.bf16.msra.mxu1 %v882_v49 }
  0x1b   : > { %884 = vmatprep.subr.bf16.mxu1 %v1079_v15 }
  0x1c   : > { %s825_s23 = sshll.u32 %s344_s22, 4  ;;  %s1259_s22 = scalar_lea.hbm %s1365_s8, %s1253_s10 }
  0x1d   : > { %s347_s26 = scalar_lea.vmem %s1371_s0, %s825_s23 }
  0x1e   : > { %v348_v1 = vld [vmem:[%s347_s26] sm:$0xff]  ;;  %v349_v2 = vld [vmem:[%s347_s26 + $0x8] sm:$0xff]  ;;  %886 = vmatpush3.bf16.msra.mxu1 %v885_v51  ;;  %s1245_s26 = sand.u32 1, %s1069_s12  }
  0x1f   : > { %v351_v3 = vsel %vm350_vm0, %v348_v1, 0.0  ;;  %v354_v4 = vsel %vm350_vm0, %v349_v2, 0.0  ;;  %887 = vmatprep.subr.bf16.mxu1 %v1079_v15  ;;  %s336_s27 = scalar_lea.vmem [#allocation5], %s1245_s26  ;;  %s342_s28 = scalar_lea.vmem [#allocation7], %s1245_s26 }
  0x20   : > { %352 = vadd.xlane.f32.xlu0 %v351_v3  ;;  %s699_s29 = sshll.u32 %s342_s28, 4  ;;  %s686_s23 = sshll.u32 %s336_s27, 4  ;;  %s1261_s29 = int_to_ptr.vmem [resolvable:$true] %s699_s29  ;;  %s687_s23 = int_to_ptr.vmem [resolvable:$true] %s686_s23 }
  0x21   : > { %s955_s25 = scalar_lea.vmem %s687_s23, 16 }
  0x22   : > { %889 = vmatpush3.bf16.msra.mxu1 %v888_v54  ;;  %p956_p11 = scmp.ne.s32.totalorder %s687_s23, %s955_s25 }
  0x23   : > { %890 = vmatprep.subr.bf16.mxu1 %v1079_v15 }
  0x24   : > { %355 = vadd.xlane.f32.xlu0 %v354_v4  ;;  %p957_p12 = pnand %p956_p11, %p1178_p5 }
  0x26   : > { %892 = vmatpush3.bf16.msra.mxu1 %v891_v57  ;;  %p958_p13 = pneg %p957_p12 }
  0x45   : > { %s894_s18 = spop %893 }
  0x46   : > { %v399_v36 = vstv %s894_s18 }
  0xad   : > { %v353_v5 = vpop.xlane.xlu0 %352 }
  0xae   : > { %v358_v6 = vmul.f32 0.015625, %v353_v5 }
  0xb0   : > { %v360_v7 = vsub.f32 %v348_v1, %v358_v6 }
  0xb1   : > { %v356_v8 = vpop.xlane.xlu0 %355 }
  0xb2   : > { %v359_v9 = vmul.f32 0.015625, %v356_v8  ;;  %v362_v10 = vmul.f32 %v360_v7, %v360_v7 }
  0xb4   : > { %v361_v11 = vsub.f32 %v349_v2, %v359_v9  ;;  %v364_v12 = vsel %vm350_vm0, %v362_v10, 0.0 }
  0xb5   : > { %365 = vadd.xlane.f32.xlu1 %v364_v12 }
  0xb6   : > { %v363_v13 = vmul.f32 %v361_v11, %v361_v11 }
  0xb8   : > { %v367_v14 = vsel %vm350_vm0, %v363_v13, 0.0 }
  0xb9   : > { %368 = vadd.xlane.f32.xlu1 %v367_v14 }
 0x142   : > { %v366_v18 = vpop.xlane.xlu1 %365 }
 0x143   : > { %v370_v19 = vmul.f32 0.015625, %v366_v18 }
 0x145   : > { %v372_v20 = vadd.f32 1e-05, %v370_v19 }
 0x146   : > { %v369_v21 = vpop.xlane.xlu1 %368 }
 0x147   : > { %947 = vrsqrt.f32 %v372_v20  ;;  %v371_v22 = vmul.f32 0.015625, %v369_v21 }
 0x149   : > { %v373_v23 = vadd.f32 1e-05, %v371_v22 }
 0x14b   : > { %949 = vrsqrt.f32 %v373_v23 }
 0x151   : > { %v948_v24 = vpop.eup %947 }
 0x152   : > { %v376_v25 = vmul.f32 %v948_v24, %v360_v7 }
 0x154   : > { %v385_v29 = vmul.f32 %v813_v26, %v376_v25 }
 0x155   : > { %v950_v27 = vpop.eup %949 }
 0x156   : > { %v377_v28 = vmul.f32 %v950_v27, %v361_v11  ;;  %v394_v32 = vadd.f32 %v814_v30, %v385_v29 }
 0x158   : > { %v386_v31 = vmul.f32 %v813_v26, %v377_v28 }
 0x15a   : > { %v395_v33 = vadd.f32 %v814_v30, %v386_v31 }
 0x15c   : > { %v875_v34 = vpack.c.bf16 %v395_v33, %v394_v32 }
 0x15e   : > { %877 = vmatpush3.bf16.xpose.msk.msra.mxu0 %vm876_vm2, %v875_v34 }
 0x15f   : > { %878 = vmatprep.subr.bf16.mxu0 %v1079_v15 }
 0x165   : > { %846 = vmatmul.mubr.msk.f32.vlgmr.msra.gmra.mrb[0].mxu0 %vm350_vm0, %v396_v35 }
 0x166   : > { %880 = vmatpush3.bf16.msra.mxu0 %v875_v34  ;;  %852 = vmatprep.mubr.msk.f32.mxu0 %vm1080_vm1, %v1081_v16 }
 0x238   : > { %v475_v37 = vpop.f32.mrb[0].mxu0 }
 0x239   : > { %v476_v38 = vadd.f32 %v475_v37, %v399_v36  ;;  %v847_v39 = vpop.f32.mrb[1].mxu0 }
 0x23b   : > { %v480_v40 = vsel %vm479_vm3, %v476_v38, -inf }
 0x23c   : > { %481 = vmax.xlane.f32.xlu0 %v480_v40 }
 0x2c9   : > { %v482_v41 = vpop.xlane.xlu0 %481 }
 0x2ca   : > { %v483_v42 = vsub.f32 %v476_v38, %v482_v41 }
 0x2cc   : > { %v484_v43 = vmul.f32 1.442695, %v483_v42 }
 0x2ce   : > { %951 = vpow2.f32 %v484_v43 }
 0x2d8   : > { %v952_v44 = vpop.eup %951 }
 0x2d9   : > { %v486_v45 = vsel %vm479_vm3, %v952_v44, 0.0 }
 0x2da   : > { %487 = vadd.xlane.f32.xlu1 %v486_v45 }
 0x367   : > { %v488_v58 = vpop.xlane.xlu1 %487 }
 0x368   : > { %953 = vrcp.f32 %v488_v58 }
 0x372   : > { %v954_v59 = vpop.eup %953 }
 0x373   : > { %v490_v60 = vmul.f32 %v954_v59, %v952_v44 }
 0x375   : > { %853 = vmatmul.mubr.msk.f32.vlgmr.msra.gmra.mrb[2].mxu0 %vm491_vm4, %v490_v60  ;;  %649 = vst.msk [vmem:[%s336_s27] sm:$0x1] %vm479_vm3, %v490_v60 }
 0x448   : > { %v561_v61 = vpop.f32.mrb[2].mxu0 }
 0x449   : > { %651 = vst.msk [vmem:[%s342_s28] sm:$0x1] %vm650_vm5, %v561_v61  ;;  %v854_v62 = vpop.f32.mrb[3].mxu0  ;;  %872 = vmatmul.mubr.msk.f32.vlgmr.msra.gmra.mrb[0].mxu1 %vm350_vm0, %v561_v61  ;;  %s1082_s28 = smov [#allocation5]  }
 0x44a   : > { %s959_s4 = sshll.u32 %s1082_s28, 4  ;;  %s960_s4 = int_to_ptr.vmem [resolvable:$false] %s959_s4 }
 0x44b   : > { %s961_s15 = scalar_lea.vmem %s960_s4, 32  ;;  %p962_p0 = scmp.lt.s32.totalorder %s687_s23, %s960_s4 }
 0x44c   : > { %p963_p1 = scmp.lt.s32.totalorder %s961_s15, %s955_s25 }
 0x44e   : > { %p964_p2 = por %p963_p1, %p962_p0 }
 0x450   : > { %p965_p3 = pnand %p964_p2, %p958_p13 }
 0x452   : > { %968 = shalt.err (!%p965_p3)
}
 0x453   : > { %s969_s27 = scalar_lea.hbm %s1259_s22, 16  ;;  %s973_s18 = scalar_lea.hbm %s1365_s8, 32 }
 0x454   : > { %p970_p4 = scmp.ne.s32.totalorder %s1259_s22, %s969_s27  ;;  %p974_p9 = scmp.lt.u32.totalorder %s1259_s22, %s1365_s8 }
 0x455   : > { %p975_p10 = scmp.lt.u32.totalorder %s973_s18, %s969_s27  ;;  %p977_p12 = scmp.lt.u32.totalorder %s969_s27, %s1259_s22 }
 0x456   : > { %p971_p7 = pnand %p970_p4, %p1178_p5 }
 0x457   : > { %p976_p11 = por %p975_p10, %p974_p9 }
 0x458   : > { %p972_p8 = pneg %p971_p7 }
 0x459   : > { %p978_p13 = por %p977_p12, %p976_p11 }
 0x45b   : > { %p979_p0 = pnand %p978_p13, %p972_p8 }
 0x45d   : > { %982 = shalt.err (!%p979_p0)
}
 0x45e   : > { %896 = dma.vmem_to_hbm [thread:$0]  (%p1178_p5), %s687_s23, 16, %s1259_s22, %s1263_s24  }
 0x45f   : > { %s697_s30 = scalar_lea.hbm %s1366_s9, %s1253_s10  ;;  %s983_s17 = scalar_lea.vmem %s1261_s29, 16 }
 0x460   : > { %p984_p1 = scmp.ne.s32.totalorder %s1261_s29, %s983_s17  ;;  %s1083_s27 = smov [#allocation7]  }
 0x461   : > { %s987_s18 = sshll.u32 %s1083_s27, 4  ;;  %s988_s18 = int_to_ptr.vmem [resolvable:$false] %s987_s18 }
 0x462   : > { %p985_p2 = pnand %p984_p1, %p1178_p5  ;;  %s989_s28 = scalar_lea.vmem %s988_s18, 32 }
 0x463   : > { %p990_p4 = scmp.lt.s32.totalorder %s1261_s29, %s988_s18  ;;  %p991_p7 = scmp.lt.s32.totalorder %s989_s28, %s983_s17 }
 0x464   : > { %p986_p3 = pneg %p985_p2 }
 0x465   : > { %p992_p8 = por %p991_p7, %p990_p4 }
 0x467   : > { %p993_p9 = pnand %p992_p8, %p986_p3 }
 0x469   : > { %996 = shalt.err (!%p993_p9)
}
 0x46a   : > { %s997_s4 = scalar_lea.hbm %s697_s30, 16  ;;  %s1001_s15 = scalar_lea.hbm %s1366_s9, 32 }
 0x46b   : > { %p998_p10 = scmp.ne.s32.totalorder %s697_s30, %s997_s4  ;;  %p1002_p13 = scmp.lt.u32.totalorder %s697_s30, %s1366_s9 }
 0x46c   : > { %p1003_p0 = scmp.lt.u32.totalorder %s1001_s15, %s997_s4  ;;  %p1005_p2 = scmp.lt.u32.totalorder %s997_s4, %s697_s30 }
 0x46d   : > { %p999_p11 = pnand %p998_p10, %p1178_p5 }
 0x46e   : > { %p1004_p1 = por %p1003_p0, %p1002_p13 }
 0x46f   : > { %p1000_p12 = pneg %p999_p11 }
 0x470   : > { %p1006_p4 = por %p1005_p2, %p1004_p1 }
 0x472   : > { %p1007_p3 = pnand %p1006_p4, %p1000_p12 }
 0x474   : > { %1010 = shalt.err (!%p1007_p3)
}
 0x475   : > { %897 = dma.vmem_to_hbm [thread:$0]  (%p1178_p5), %s1261_s29, 16, %s697_s30, %s1263_s24   ;;  %v573_v63 = vld [vmem:[%s1363_s6] sm:$0x1]  ;;  %vm647_vm6 = vcmask 73728  }
 0x476   : > { %s330_s0 = scalar_lea.vmem [#allocation3], %s1245_s26  ;;  %s1312_s22 = scalar_lea.hbm %s1364_s7, %s1253_s10 }
 0x477   : > { %s673_s18 = sshll.u32 %s330_s0, 4  ;;  %s653_s29 = scalar_lea.sflag [#allocation4], %s1245_s26  ;;  %s1314_s18 = int_to_ptr.vmem [resolvable:$true] %s673_s18 }
 0x478   : > { %s1011_s24 = scalar_lea.vmem %s1314_s18, 16  ;;  %s1084_s30 = smov [#allocation3]  }
 0x479   : > { %p1012_p7 = scmp.ne.s32.totalorder %s1314_s18, %s1011_s24  ;;  %s1015_s23 = sshll.u32 %s1084_s30, 4  ;;  %s1016_s23 = int_to_ptr.vmem [resolvable:$false] %s1015_s23 }
 0x47a   : > { %s1017_s15 = scalar_lea.vmem %s1016_s23, 32  ;;  %p1018_p10 = scmp.lt.s32.totalorder %s1314_s18, %s1016_s23 }
 0x47b   : > { %p1013_p8 = pnand %p1012_p7, %p1178_p5  ;;  %p1019_p11 = scmp.lt.s32.totalorder %s1017_s15, %s1011_s24 }
 0x47d   : > { %p1014_p9 = pneg %p1013_p8  ;;  %p1020_p12 = por %p1019_p11, %p1018_p10 }
 0x47f   : > { %p1021_p13 = pnand %p1020_p12, %p1014_p9 }
 0x51c   : > { %v643_v0 = vpop.f32.mrb[0].mxu1 }
 0x51d   : > { %v644_v1 = vadd.f32 %v643_v0, %v573_v63  ;;  %v873_v2 = vpop.f32.mrb[1].mxu1 }
 0x51f   : > { %648 = vst.msk [vmem:[%s330_s0] sm:$0x1] %vm647_vm6, %v644_v1 }
 0x520   : > { %1024 = shalt.err (!%p1021_p13)
}
 0x521   : > { %s1025_s26 = scalar_lea.hbm %s1312_s22, 16  ;;  %s1029_s17 = scalar_lea.hbm %s1364_s7, 32 }
 0x522   : > { %p1026_p0 = scmp.ne.s32.totalorder %s1312_s22, %s1025_s26  ;;  %p1030_p4 = scmp.lt.u32.totalorder %s1312_s22, %s1364_s7 }
 0x523   : > { %p1031_p3 = scmp.lt.u32.totalorder %s1029_s17, %s1025_s26  ;;  %p1033_p8 = scmp.lt.u32.totalorder %s1025_s26, %s1312_s22 }
 0x524   : > { %p1027_p1 = pnand %p1026_p0, %p1178_p5 }
 0x525   : > { %p1032_p7 = por %p1031_p3, %p1030_p4 }
 0x526   : > { %p1028_p2 = pneg %p1027_p1 }
 0x527   : > { %p1034_p9 = por %p1033_p8, %p1032_p7 }
 0x529   : > { %p1035_p10 = pnand %p1034_p9, %p1028_p2 }
 0x52b   : > { %1038 = shalt.err (!%p1035_p10)
}
 0x52c   : > { %895 = dma.vmem_to_hbm [thread:$0]  (%p1178_p5), %s1314_s18, 16, %s1312_s22, %s653_s29  }
 0x52d PF: > { %p911_p11 = scmp.ge.s32.totalorder %s1077_s14, 2  ;;  %s711_s28 = sand.u32 1, %s1065_s11  }
 0x52e   : > { %s712_s4 = scalar_lea.sflag [#allocation4], %s711_s28 }
 0x52f   : > { %p902_p12 = pnand %p911_p11, %p1182_p6 }
 0x531   : > { %1056 = dma.done.wait (!%p902_p12), %s712_s4, 16  }
 0x532   : > { %1058 = vsyncadd (!%p902_p12), %s712_s4, 4294967280  ;;  %s1372_s24 = sadd.s32 4294967294, %s1077_s14  }
 0x533   : > { %s719_s30 = sand.u32 1, %s1372_s24  }
 0x534   : > { %s720_s23 = scalar_lea.sflag [#allocation6], %s719_s30 }
 0x535   : > { %1060 = dma.done.wait (!%p902_p12), %s720_s23, 32  }
 0x536   : > { %1062 = vsyncadd (!%p902_p12), %s720_s23, 4294967264  ;;  %p25_p5 = scmp.ge.s32.totalorder %s1163_s16, 4   ;;  %s1373_s11 = smov %s1069_s12 }
 0x537   : > { %s1374_s12 = smov %s1073_s13  ;;  %s1375_s13 = smov %s1176_s19 }
 0x538   : > { %s1376_s14 = smov %s1163_s16  ;;  %27 = sbr.rel (!%p25_p5) target bundleno = 8 (0x8), region = 115 }
 0x53f   :  { %732 = vsyncpa [#allocation4], 1 }
 0x540   :  { %734 = vsyncpa [#allocation4 + $0x1], 1 }
 0x541   :  { %735 = vsyncpa [#allocation6], 1 }
 0x542   :  { %737 = vsyncpa [#allocation6 + $0x1], 1 }

// kernel: cdcl_forward.4
= control target key start
LH: loop header
LB: loop body
LE: loop exit
PB: predicated region body
PF: predicated region fallthrough
CT: control target
= control target key end

     0   :  { %s2562_s29 = smov 0   ;;  %s2564_s30 = smov 0   ;;  %s2893_s0 = inlined_call_operand.vmem [shape: f32[32,64], index: 0, kind: input, shape index: {}]   ;;  %s2894_s1 = inlined_call_operand.vmem [shape: f32[2,1,64], index: 1, kind: input, shape index: {}]   ;;  %s2895_s2 = inlined_call_operand.vmem [shape: f32[2,1,64], index: 2, kind: input, shape index: {}]   ;;  %s2896_s3 = inlined_call_operand.vmem [shape: bf16[2,64,64], index: 3, kind: input, shape index: {}]   ;;  %s2897_s4 = inlined_call_operand.vmem [shape: bf16[2,64,64], index: 4, kind: input, shape index: {}]   ;;  %s2898_s5 = inlined_call_operand.vmem [shape: bf16[2,64,64], index: 5, kind: input, shape index: {}]   ;;  %s2899_s6 = inlined_call_operand.vmem [shape: bf16[2,64,64], index: 6, kind: input, shape index: {}]   ;;  %s2900_s7 = inlined_call_operand.vmem [shape: f32[2,1,64], index: 7, kind: input, shape index: {}]   ;;  %s2901_s8 = inlined_call_operand.vmem [shape: f32[2,1,64], index: 8, kind: input, shape index: {}]   ;;  %s2902_s9 = inlined_call_operand.vmem [shape: f32[2,1,64], index: 9, kind: input, shape index: {}]   ;;  %s2903_s10 = inlined_call_operand.vmem [shape: bf16[2,64,128], index: 10, kind: input, shape index: {}]   ;;  %s2904_s11 = inlined_call_operand.vmem [shape: f32[2,1,128], index: 11, kind: input, shape index: {}]   ;;  %s2905_s12 = inlined_call_operand.vmem [shape: bf16[2,128,64], index: 12, kind: input, shape index: {}]   ;;  %s2906_s13 = inlined_call_operand.vmem [shape: f32[2,1,64], index: 13, kind: input, shape index: {}]   ;;  %s2907_s14 = inlined_call_operand.vmem [shape: f32[32,64], index: 14, kind: output, shape index: {}]  }
   0x1   :  { %2913 = sst [smem:[#allocation10_spill]] %s2893_s0  ;;  %s2566_s15 = smov 0  }
   0x2   :  { %2914 = sst [smem:[#allocation11_spill]] %s2896_s3  ;;  %s2568_s16 = smov 0  }
   0x3   :  { %2915 = sst [smem:[#allocation12_spill]] %s2897_s4  ;;  %s2570_s17 = smov 0  }
   0x4   :  { %2916 = sst [smem:[#allocation13_spill]] %s2898_s5 }
   0x5   :  { %2917 = sst [smem:[#allocation14_spill]] %s2899_s6 }
   0x6   :  { %2918 = sst [smem:[#allocation15_spill]] %s2901_s8 }
   0x7   :  { %2919 = sst [smem:[#allocation16_spill]] %s2905_s12 }
   0x8   :  { %2920 = sst [smem:[#allocation17_spill]] %s2907_s14 }
   0x9 LB: > { %2921 = sst [smem:[#allocation3_spill]] %s2461_s29  ;;  %s33_s18 = sadd.s32 1, %s2469_s15  ;;  %s2477_s17 = sphi %s2570_s17, %s24_s17   ;;  %s2473_s16 = sphi %s2568_s16, %s2948_s16   ;;  %s2469_s15 = sphi %s2566_s15, %s2947_s15   ;;  %s2465_s30 = sphi %s2564_s30, %s2946_s30   ;;  %s2461_s29 = sphi %s2562_s29, %s2945_s29  }
   0xa   : > { %2922 = sst [smem:[#allocation4_spill]] %s2469_s15  ;;  %s36_s19 = sadd.s32 1, %s2473_s16 }
   0xb   : > { %2923 = sst [smem:[#allocation5_spill]] %s2473_s16  ;;  %p34_p0 = scmp.ge.s32.totalorder %s33_s18, 2 }
   0xc   : > { %2924 = sst [smem:[#allocation6_spill]] %s2477_s17  ;;  %p2067_p1 = scmp.ge.s32.totalorder %s2477_s17, 1 }
   0xd   : > { %p541_p2 = scmp.lt.s32.totalorder %s2477_s17, 5  ;;  %s2950_s18 = smov (%p34_p0, %s33_s18), 0 }
   0xe   : > { %2925 = sst [smem:[#allocation7_spill]] %s2950_s18  ;;  %s2952_s19 = smov (!%p34_p0, %s36_s19), %s2473_s16 }
   0xf   : > { %p542_p3 = pnand %p2067_p1, %p541_p2  ;;  %p38_p4 = scmp.ge.s32.totalorder %s2952_s19, 2 }
  0x11   : > { %s2954_s19 = smov (%p38_p4, %s2952_s19), 0  ;;  %545 = sbr.rel (%p542_p3) target bundleno = 2660 (0xa64), region = 76 }
  0x12   : > { %2926 = sst [smem:[#allocation8_spill]] %s2954_s19 }
  0x18   : > { %s2068_s20 = sshll.u32 %s2465_s30, 1  ;;  %p644_p5 = scmp.lt.s32.totalorder %s2461_s29, 1 }
  0x19   : > { %p639_p6 = scmp.lt.s32.totalorder %s2068_s20, 3  ;;  %s2927_s0 = sld [smem:[#allocation10_spill]] }
  0x1a   : > { %s2596_s21 = scalar_select %p644_p5, %s2461_s29, 1 }
  0x1b   : > { %s2956_s20 = smov (!%p639_p6, %s2068_s20), 3  ;;  %s2928_s3 = sld [smem:[#allocation11_spill]] }
  0x1c   : > { %s2069_s28 = sshll.u32 %s2956_s20, 3  ;;  %s2135_s30 = sshll.u32 %s2596_s21, 5 }
  0x1d   : > { %s2929_s4 = sld [smem:[#allocation12_spill]]  ;;  %s2930_s5 = sld [smem:[#allocation13_spill]] }
  0x1e   : > { %s2931_s6 = sld [smem:[#allocation14_spill]]  ;;  %s694_s15 = scalar_lea.vmem %s2906_s13, %s2596_s21 }
  0x1f   : > { %s642_s16 = scalar_lea.vmem %s2927_s0, %s2069_s28  ;;  %s2934_s12 = sld [smem:[#allocation16_spill]] }
  0x21   : > { %s2613_s29 = scalar_lea.vmem %s2928_s3, %s2135_s30 }
  0x23   : > { %s2618_s22 = scalar_lea.vmem %s2929_s4, %s2135_s30  ;;  %s2623_s25 = scalar_lea.vmem %s2930_s5, %s2135_s30 }
  0x24   : > { %s2628_s18 = scalar_lea.vmem %s2931_s6, %s2135_s30  ;;  %s2645_s5 = scalar_lea.vmem %s2903_s10, %s2135_s30 }
  0x25   : > { %2932 = sst [smem:[#allocation9_spill]] %s2628_s18  ;;  %s686_s6 = scalar_lea.vmem %s2904_s11, %s2596_s21 }
  0x26   : > { %s2140_s18 = sshll.u32 %s2596_s21, 6  ;;  %s2935_s4 = sld [smem:[#allocation17_spill]] }
  0x27   : > { %s2659_s8 = scalar_lea.vmem %s2934_s12, %s2140_s18  ;;  %s2936_s30 = sld [smem:[#allocation3_spill]] }
  0x2c   : > { %s2664_s24 = scalar_lea.vmem %s2935_s4, %s2069_s28 }
  0x2d   : > { %p2084_p7 = scmp.ne.s32.totalorder %s2936_s30, 0 }
  0x2e   : > { %v706_v0 = vld [vmem:[%s642_s16] sm:$0xff] (!%p2084_p7)  ;;  %vm708_vm0 = vcmask (!%p2084_p7), 523264   ;;  %v707_v1 = vld [vmem:[%s642_s16 + $0x8] sm:$0xff] (!%p2084_p7) }
  0x2f   : > { %705 = sbr.rel (%p2084_p7) target bundleno = 54 (0x36), region = 80  ;;  %709 = vst.msk [vmem:[%s2664_s24] sm:$0xff] (!%p2084_p7), %vm708_vm0, %v706_v0  ;;  %710 = vst.msk [vmem:[%s2664_s24 + $0x8] sm:$0xff] (!%p2084_p7), %vm708_vm0, %v707_v1 }
  0x36 PF: > { %v2670_v2 = vld [vmem:[%s2664_s24] sm:$0xff]  ;;  %vm715_vm1 = vcmask 523264   ;;  %v2673_v3 = vld [vmem:[%s2664_s24 + $0x8] sm:$0xff]  ;;  %v2479_v17 = vmov 0.0   ;;  %v2371_v21 = vld [vmem:[%s2613_s29 + $0x10] sm:$0xff]   ;;  %vm2480_vm2 = vmmov 0   ;;  %s2937_s16 = scalar_lea.vmem %s2894_s1, %s2596_s21  ;;  %s2938_s18 = scalar_lea.vmem %s2895_s2, %s2596_s21 }
  0x37   : > { %v716_v4 = vsel %vm715_vm1, %v2670_v2, 0.0  ;;  %v719_v5 = vsel %vm715_vm1, %v2673_v3, 0.0  ;;  %v2367_v16 = vld [vmem:[%s2613_s29] sm:$0xff]   ;;  %2191 = vmatprep.subr.bf16.mxu1 %v2479_v17  ;;  %2215 = vmatprep.subr.bf16.mxu0 %v2479_v17  ;;  %v2369_v19 = vld [vmem:[%s2613_s29 + $0x8] sm:$0xff]   ;;  %v2372_v22 = vld [vmem:[%s2623_s25 + $0x10] sm:$0xff]   ;;  %vm985_vm3 = vcmask 130048   ;;  %s2940_s3 = scalar_lea.vmem %s2900_s7, %s2596_s21  ;;  %s2943_s28 = scalar_lea.vmem %s2902_s9, %s2596_s21 }
  0x38   : > { %717 = vadd.xlane.f32.xlu0 %v716_v4  ;;  %v2368_v18 = vld [vmem:[%s2623_s25] sm:$0xff]   ;;  %2192 = vmatpush3.bf16.msra.mxu1 %v2367_v16  ;;  %v2370_v20 = vld [vmem:[%s2623_s25 + $0x8] sm:$0xff]   ;;  %v2373_v23 = vld [vmem:[%s2613_s29 + $0x18] sm:$0xff]   ;;  %s2482_s12 = smov 96   ;;  %s2483_s23 = smov 80   ;;  %vm1238_vm4 = vcmask 261248  }
  0x39   : > { %2216 = vmatpush3.bf16.msra.mxu0 %v2368_v18  ;;  %2193 = vmatprep.subr.bf16.mxu1 %v2479_v17  ;;  %v2374_v24 = vld [vmem:[%s2623_s25 + $0x18] sm:$0xff]   ;;  %v2085_v33 = vld [vmem:[%s2937_s16] ss:$0 sm:$0xff]  ;;  %v2376_v43 = vld [vmem:[%s2618_s22 + $0x8] sm:$0xff]   ;;  %s2939_s20 = sld [smem:[#allocation9_spill]]  ;;  %s2484_s26 = smov 16  }
  0x3a   : > { %2217 = vmatprep.subr.bf16.mxu0 %v2479_v17  ;;  %2199 = vmatprep.mubr.msk.bf16.mxu1 %vm2480_vm2, %v2479_v17  ;;  %v2086_v37 = vld [vmem:[%s2938_s18] ss:$0 sm:$0xff]  ;;  %v2377_v44 = vld [vmem:[%s2618_s22 + $0x10] sm:$0xff]   ;;  %v2378_v45 = vld [vmem:[%s2618_s22 + $0x18] sm:$0xff]   ;;  %s2485_s27 = smov 32   ;;  %s2486_s19 = smov 48  }
  0x3b   : > { %2223 = vmatprep.mubr.msk.bf16.mxu0 %vm2480_vm2, %v2479_v17  ;;  %v2375_v41 = vld [vmem:[%s2618_s22] sm:$0xff]   ;;  %s2481_s22 = smov 112   ;;  %vm1372_vm5 = vcmask 392448   ;;  %vm1506_vm6 = vcmask 523648   ;;  %s2941_s4 = sld [smem:[#allocation15_spill]] }
  0x3c   : > { %720 = vadd.xlane.f32.xlu0 %v719_v5  ;;  %2194 = vmatpush3.bf16.msra.mxu1 %v2369_v19 }
  0x3d   : > { %2218 = vmatpush3.bf16.msra.mxu0 %v2370_v20  ;;  %2195 = vmatprep.subr.bf16.mxu1 %v2479_v17 }
  0x3e   : > { %2219 = vmatprep.subr.bf16.mxu0 %v2479_v17 }
  0x40   : > { %2196 = vmatpush3.bf16.msra.mxu1 %v2371_v21 }
  0x41   : > { %2220 = vmatpush3.bf16.msra.mxu0 %v2372_v22  ;;  %2197 = vmatprep.subr.bf16.mxu1 %v2479_v17  ;;  %s2942_s29 = scalar_lea.vmem %s2941_s4, %s2596_s21 }
  0x42   : > { %2221 = vmatprep.subr.bf16.mxu0 %v2479_v17 }
  0x44   : > { %2198 = vmatpush3.bf16.msra.mxu1 %v2373_v23 }
  0x45   : > { %2222 = vmatpush3.bf16.msra.mxu0 %v2374_v24  ;;  %2203 = vmatprep.subr.bf16.mxu1 %v2479_v17 }
  0x46   : > { %2239 = vmatprep.subr.bf16.mxu0 %v2479_v17 }
  0xc5   : > { %v718_v6 = vpop.xlane.xlu0 %717 }
  0xc6   : > { %v723_v7 = vmul.f32 0.015625, %v718_v6 }
  0xc8   : > { %v725_v8 = vsub.f32 %v2670_v2, %v723_v7 }
  0xc9   : > { %v721_v9 = vpop.xlane.xlu0 %720 }
  0xca   : > { %v724_v10 = vmul.f32 0.015625, %v721_v9  ;;  %v727_v11 = vmul.f32 %v725_v8, %v725_v8 }
  0xcc   : > { %v726_v12 = vsub.f32 %v2673_v3, %v724_v10  ;;  %v729_v13 = vsel %vm715_vm1, %v727_v11, 0.0 }
  0xcd   : > { %730 = vadd.xlane.f32.xlu1 %v729_v13 }
  0xce   : > { %v728_v14 = vmul.f32 %v726_v12, %v726_v12 }
  0xd0   : > { %v732_v15 = vsel %vm715_vm1, %v728_v14, 0.0 }
  0xd1   : > { %733 = vadd.xlane.f32.xlu1 %v732_v15 }
 0x15a   : > { %v731_v25 = vpop.xlane.xlu1 %730 }
 0x15b   : > { %v735_v26 = vmul.f32 0.015625, %v731_v25 }
 0x15d   : > { %v737_v27 = vadd.f32 1e-05, %v735_v26 }
 0x15e   : > { %v734_v28 = vpop.xlane.xlu1 %733 }
 0x15f   : > { %2395 = vrsqrt.f32 %v737_v27  ;;  %v736_v29 = vmul.f32 0.015625, %v734_v28 }
 0x161   : > { %v738_v30 = vadd.f32 1e-05, %v736_v29 }
 0x163   : > { %2397 = vrsqrt.f32 %v738_v30 }
 0x169   : > { %v2396_v31 = vpop.eup %2395 }
 0x16a   : > { %v741_v32 = vmul.f32 %v2396_v31, %v725_v8 }
 0x16c   : > { %v749_v36 = vmul.f32 %v2085_v33, %v741_v32 }
 0x16d   : > { %v2398_v34 = vpop.eup %2397 }
 0x16e   : > { %v742_v35 = vmul.f32 %v2398_v34, %v726_v12  ;;  %v757_v39 = vadd.f32 %v2086_v37, %v749_v36 }
 0x170   : > { %v750_v38 = vmul.f32 %v2085_v33, %v742_v35 }
 0x172   : > { %v758_v40 = vadd.f32 %v2086_v37, %v750_v38 }
 0x174   : > { %v759_v42 = vpack.c.bf16 %v758_v40, %v757_v39 }
 0x176   : > { %2200 = vmatmul.mubr.msk.bf16.vlgmr.msra.gmra.mrb[0].mxu1 %vm715_vm1, %v759_v42  ;;  %2224 = vmatmul.mubr.msk.bf16.vlgmr.msra.gmra.mrb[0].mxu0 %vm715_vm1, %v759_v42 }
 0x177   : > { %2204 = vmatpush3.bf16.msra.mxu1 %v2375_v41  ;;  %2211 = vmatprep.mubr.msk.bf16.mxu1 %vm2480_vm2, %v2479_v17 }
 0x178   : > { %2205 = vmatprep.subr.bf16.mxu1 %v2479_v17  ;;  %2241 = vmatprep.mubr.msk.bf16.mxu0 %vm2480_vm2, %v2479_v17 }
 0x17b   : > { %2206 = vmatpush3.bf16.msra.mxu1 %v2376_v43 }
 0x17c   : > { %2207 = vmatprep.subr.bf16.mxu1 %v2479_v17 }
 0x17f   : > { %2208 = vmatpush3.bf16.msra.mxu1 %v2377_v44 }
 0x180   : > { %2209 = vmatprep.subr.bf16.mxu1 %v2479_v17 }
 0x183   : > { %2210 = vmatpush3.bf16.msra.mxu1 %v2378_v45 }
 0x184   : > { %2227 = vmatprep.subr.bf16.mxu1 %v2479_v17 }
 0x186   : > { %2212 = vmatmul.mubr.msk.bf16.vlgmr.msra.gmra.mrb[4].mxu1 %vm715_vm1, %v759_v42 }
 0x187   : > { %2229 = vmatprep.mubr.msk.bf16.mxu1 %vm2480_vm2, %v2479_v17 }
 0x249   : > { %v829_v46 = vpop.f32.mrb[0].mxu1  ;;  %v975_v47 = vpop.f32.mrb[0].mxu0 }
 0x24a   : > { %v2201_v48 = vpop.f32.mrb[1].mxu1  ;;  %v2225_v49 = vpop.f32.mrb[1].mxu0 }
 0x24b   : > { %v832_v50 = vpop.f32.mrb[2].mxu1  ;;  %v978_v51 = vpop.f32.mrb[2].mxu0 }
 0x24c   : > { %v982_v52 = vpack.c.bf16 %v832_v50, %v829_v46  ;;  %v2732_v53 = vpack.c.bf16 %v978_v51, %v975_v47  ;;  %v2202_v54 = vpop.f32.mrb[3].mxu1  ;;  %v2226_v55 = vpop.f32.mrb[3].mxu0 }
 0x24e   : > { %1105 = vrot.lane.b32.xlu1 %v982_v52, %s2481_s22 }
 0x259   : > { %v902_v56 = vpop.f32.mrb[4].mxu1 }
 0x25a   : > { %v2213_v57 = vpop.f32.mrb[5].mxu1 }
 0x25b   : > { %v905_v58 = vpop.f32.mrb[6].mxu1 }
 0x25c   : > { %v983_v59 = vpack.c.bf16 %v905_v58, %v902_v56  ;;  %v2214_v60 = vpop.f32.mrb[7].mxu1 }
 0x25e   : > { %1243 = vrot.lane.b32.xlu1 %v983_v59, %s2482_s12  ;;  %1108 = vrot.lane.b32.xlu0 %v983_v59, %s2481_s22  ;;  %v990_v61 = vsel %vm985_vm3, %v983_v59, 0 }
 0x25f   : > { %2228 = vmatpush3.bf16.xpose.msra.mxu1 %v990_v61 }
 0x260   : > { %2233 = vmatprep.subr.bf16.mxu1 %v2479_v17 }
 0x262   : > { %1241 = vrot.lane.b32.xlu1 %v982_v52, %s2482_s12  ;;  %1377 = vrot.lane.b32.xlu0 %v983_v59, %s2483_s23 }
 0x266   : > { %1375 = vrot.lane.b32.xlu1 %v982_v52, %s2483_s23  ;;  %2230 = vmatmul.mubr.msk.bf16.vlgmr.msra.gmra.mrb[8].mxu1 %vm985_vm3, %v982_v52 }
 0x267   : > { %2234 = vmatpush3.bf16.msra.mxu1 %v2732_v53  ;;  %2235 = vmatprep.mubr.msk.bf16.mxu1 %vm2480_vm2, %v2479_v17 }
 0x268   : > { %2245 = vmatprep.subr.bf16.mxu1 %v2479_v17 }
 0x2c0   : > { %v1106_v0 = vpop.permute.xlu1 %1105 }
 0x2d0   : > { %v1109_v62 = vpop.permute.xlu0 %1108  ;;  %v1244_v1 = vpop.permute.xlu1 %1243 }
 0x2d1   : > { %v1114_v63 = vsel %vm985_vm3, %v1109_v62, 0  ;;  %v1249_v4 = vsel %vm985_vm3, %v1244_v1, 0 }
 0x2d2   : > { %2240 = vmatpush3.bf16.xpose.msra.mxu0 %v1114_v63 }
 0x2d3   : > { %2251 = vmatprep.subr.bf16.mxu0 %v2479_v17 }
 0x2d4   : > { %v1378_v5 = vpop.permute.xlu0 %1377  ;;  %v1242_v6 = vpop.permute.xlu1 %1241 }
 0x2d5   : > { %v1383_v7 = vsel %vm985_vm3, %v1378_v5, 0 }
 0x2d8   : > { %v1376_v8 = vpop.permute.xlu1 %1375 }
 0x2d9   : > { %2242 = vmatmul.mubr.msk.bf16.vlgmr.msra.gmra.mrb[4].mxu0 %vm985_vm3, %v1106_v0 }
 0x2da   : > { %2252 = vmatpush3.bf16.xpose.msra.mxu0 %v1249_v4  ;;  %2253 = vmatprep.mubr.msk.bf16.mxu0 %vm2480_vm2, %v2479_v17 }
 0x2db   : > { %2263 = vmatprep.subr.bf16.mxu0 %v2479_v17 }
 0x2e1   : > { %2254 = vmatmul.mubr.msk.bf16.vlgmr.msra.gmra.mrb[8].mxu0 %vm985_vm3, %v1242_v6 }
 0x2e2   : > { %2264 = vmatpush3.bf16.xpose.msra.mxu0 %v1383_v7  ;;  %2265 = vmatprep.mubr.msk.bf16.mxu0 %vm2480_vm2, %v2479_v17 }
 0x2e3   : > { %2275 = vmatprep.subr.bf16.mxu0 %v2479_v17 }
 0x2e9   : > { %2266 = vmatmul.mubr.msk.bf16.vlgmr.msra.gmra.mrb[12].mxu0 %vm985_vm3, %v1376_v8 }
 0x2ea   : > { %2283 = vmatprep.mubr.msk.bf16.mxu0 %vm2480_vm2, %v2479_v17 }
 0x339   : > { %v1026_v9 = vpop.f32.mrb[8].mxu1 }
 0x33a   : > { %v1033_v10 = vmul.f32 0.25, %v1026_v9  ;;  %v2231_v11 = vpop.f32.mrb[9].mxu1 }
 0x33b   : > { %v1029_v12 = vpop.f32.mrb[10].mxu1 }
 0x33c   : > { %v1034_v13 = vmul.f32 0.25, %v1029_v12  ;;  %v2232_v14 = vpop.f32.mrb[11].mxu1  ;;  %v1035_v15 = vsel %vm985_vm3, %v1033_v10, -inf }
 0x33d   : > { %1036 = vmax.xlane.f32.xlu0 %v1035_v15 }
 0x33e   : > { %v1038_v16 = vsel %vm985_vm3, %v1034_v13, -inf }
 0x33f   : > { %1039 = vmax.xlane.f32.xlu1 %v1038_v16 }
 0x3ac   : > { %v1150_v18 = vpop.f32.mrb[4].mxu0 }
 0x3ad   : > { %v1157_v19 = vmul.f32 0.25, %v1150_v18  ;;  %v2243_v20 = vpop.f32.mrb[5].mxu0 }
 0x3ae   : > { %v1153_v21 = vpop.f32.mrb[6].mxu0 }
 0x3af   : > { %v1158_v22 = vmul.f32 0.25, %v1153_v21  ;;  %v2244_v23 = vpop.f32.mrb[7].mxu0  ;;  %v1159_v24 = vsel %vm985_vm3, %v1157_v19, -inf }
 0x3b0   : > { %1160 = vmax.xlane.f32.xlu0 %v1159_v24 }
 0x3b1   : > { %v1162_v25 = vsel %vm985_vm3, %v1158_v22, -inf }
 0x3b4   : > { %v1285_v26 = vpop.f32.mrb[8].mxu0  ;;  %1163 = vmax.xlane.f32.xlu0 %v1162_v25 }
 0x3b5   : > { %v1292_v27 = vmul.f32 0.25, %v1285_v26  ;;  %v2255_v28 = vpop.f32.mrb[9].mxu0 }
 0x3b6   : > { %v1288_v29 = vpop.f32.mrb[10].mxu0 }
 0x3b7   : > { %v1293_v30 = vmul.f32 0.25, %v1288_v29  ;;  %v2256_v31 = vpop.f32.mrb[11].mxu0  ;;  %v1294_v32 = vsel %vm985_vm3, %v1292_v27, -inf }
 0x3b8   : > { %1295 = vmax.xlane.f32.xlu0 %v1294_v32 }
 0x3b9   : > { %v1297_v33 = vsel %vm985_vm3, %v1293_v30, -inf }
 0x3ba   : > { %1298 = vmax.xlane.f32.xlu1 %v1297_v33 }
 0x3bc   : > { %v1419_v34 = vpop.f32.mrb[12].mxu0 }
 0x3bd   : > { %v1426_v35 = vmul.f32 0.25, %v1419_v34  ;;  %v2267_v36 = vpop.f32.mrb[13].mxu0 }
 0x3be   : > { %v1422_v37 = vpop.f32.mrb[14].mxu0 }
 0x3bf   : > { %v2768_v38 = vmul.f32 0.25, %v1422_v37  ;;  %v2268_v39 = vpop.f32.mrb[15].mxu0  ;;  %v1428_v40 = vsel %vm985_vm3, %v1426_v35, -inf }
 0x3c0   : > { %1429 = vmax.xlane.f32.xlu0 %v1428_v40 }
 0x3c1   : > { %v1431_v41 = vsel %vm985_vm3, %v2768_v38, -inf }
 0x3c2   : > { %1432 = vmax.xlane.f32.xlu1 %v1431_v41 }
 0x3ca   : > { %v1037_v42 = vpop.xlane.xlu0 %1036 }
 0x3cb   : > { %v1041_v43 = vsub.f32 %v1033_v10, %v1037_v42 }
 0x3cc   : > { %v1040_v44 = vpop.xlane.xlu1 %1039 }
 0x3cd   : > { %v1043_v45 = vmul.f32 1.442695, %v1041_v43  ;;  %v1042_v46 = vsub.f32 %v1034_v13, %v1040_v44 }
 0x3cf   : > { %2399 = vpow2.f32 %v1043_v45  ;;  %v1045_v47 = vmul.f32 1.442695, %v1042_v46 }
 0x3d1   : > { %2401 = vpow2.f32 %v1045_v47 }
 0x3d9   : > { %v2400_v48 = vpop.eup %2399 }
 0x3da   : > { %v1047_v49 = vsel %vm985_vm3, %v2400_v48, 0.0 }
 0x3db   : > { %v2402_v50 = vpop.eup %2401  ;;  %1048 = vadd.xlane.f32.xlu0 %v1047_v49 }
 0x3dc   : > { %v1050_v51 = vsel %vm985_vm3, %v2402_v50, 0.0 }
 0x3dd   : > { %1051 = vadd.xlane.f32.xlu1 %v1050_v51 }
 0x43d   : > { %v1161_v52 = vpop.xlane.xlu0 %1160 }
 0x43e   : > { %v1165_v54 = vsub.f32 %v1157_v19, %v1161_v52 }
 0x440   : > { %v1167_v55 = vmul.f32 1.442695, %v1165_v54 }
 0x441   : > { %v1164_v56 = vpop.xlane.xlu0 %1163 }
 0x442   : > { %2403 = vpow2.f32 %v1167_v55  ;;  %v1166_v57 = vsub.f32 %v1158_v22, %v1164_v56 }
 0x444   : > { %v1169_v58 = vmul.f32 1.442695, %v1166_v57  ;;  %v2379_v57 = vld [vmem:[%s2939_s20] sm:$0xff]  }
 0x445   : > { %v1296_v59 = vpop.xlane.xlu0 %1295  ;;  %2276 = vmatpush3.bf16.msra.mxu0 %v2379_v57 }
 0x446   : > { %2405 = vpow2.f32 %v1169_v58  ;;  %v1300_v60 = vsub.f32 %v1292_v27, %v1296_v59  ;;  %2277 = vmatprep.subr.bf16.mxu0 %v2479_v17 }
 0x447   : > { %v1299_v61 = vpop.xlane.xlu1 %1298 }
 0x448   : > { %v1302_v62 = vmul.f32 1.442695, %v1300_v60  ;;  %v1301_v63 = vsub.f32 %v1293_v30, %v1299_v61 }
 0x44a   : > { %2407 = vpow2.f32 %v1302_v62  ;;  %v1304_v0 = vmul.f32 1.442695, %v1301_v63 }
 0x44c   : > { %v2404_v1 = vpop.eup %2403  ;;  %2409 = vpow2.f32 %v1304_v0 }
 0x44d   : > { %v1430_v4 = vpop.xlane.xlu0 %1429  ;;  %v1171_v5 = vsel %vm985_vm3, %v2404_v1, 0.0 }
 0x44e   : > { %v1434_v6 = vsub.f32 %v1426_v35, %v1430_v4  ;;  %1172 = vadd.xlane.f32.xlu0 %v1171_v5  ;;  %v2380_v4 = vld [vmem:[%s2939_s20 + $0x8] sm:$0xff]   ;;  %v2381_v5 = vld [vmem:[%s2939_s20 + $0x10] sm:$0xff]  }
 0x44f   : > { %v1433_v16 = vpop.xlane.xlu1 %1432  ;;  %2278 = vmatpush3.bf16.msra.mxu0 %v2380_v4  ;;  %v2392_v4 = vld [vmem:[%s2659_s8 + $0x28] sm:$0xff]  }
 0x450   : > { %v2406_v7 = vpop.eup %2405  ;;  %v1436_v8 = vmul.f32 1.442695, %v1434_v6  ;;  %v1435_v24 = vsub.f32 %v2768_v38, %v1433_v16  ;;  %2279 = vmatprep.subr.bf16.mxu0 %v2479_v17  ;;  %v2382_v6 = vld [vmem:[%s2939_s20 + $0x18] sm:$0xff]  }
 0x451   : > { %v1174_v9 = vsel %vm985_vm3, %v2406_v7, 0.0 }
 0x452   : > { %2411 = vpow2.f32 %v1436_v8  ;;  %1175 = vadd.xlane.f32.xlu1 %v1174_v9  ;;  %v1438_v26 = vmul.f32 1.442695, %v1435_v24 }
 0x453   : > { %2280 = vmatpush3.bf16.msra.mxu0 %v2381_v5  ;;  %v2393_v5 = vld [vmem:[%s2659_s8 + $0x30] sm:$0xff]  }
 0x454   : > { %v2408_v10 = vpop.eup %2407  ;;  %2281 = vmatprep.subr.bf16.mxu0 %v2479_v17 }
 0x455   : > { %v1306_v11 = vsel %vm985_vm3, %v2408_v10, 0.0 }
 0x456   : > { %v2410_v12 = vpop.eup %2409  ;;  %1307 = vadd.xlane.f32.xlu0 %v1306_v11 }
 0x457   : > { %v1309_v13 = vsel %vm985_vm3, %v2410_v12, 0.0  ;;  %2282 = vmatpush3.bf16.msra.mxu0 %v2382_v6  ;;  %v2394_v6 = vld [vmem:[%s2659_s8 + $0x38] sm:$0xff]  }
 0x458   : > { %1310 = vadd.xlane.f32.xlu1 %v1309_v13  ;;  %2299 = vmatprep.subr.bf16.mxu0 %v2479_v17 }
 0x45c   : > { %v2412_v14 = vpop.eup %2411 }
 0x45d   : > { %v1440_v15 = vsel %vm985_vm3, %v2412_v14, 0.0 }
 0x45e   : > { %1441 = vadd.xlane.f32.xlu0 %v1440_v15 }
 0x468   : > { %v1049_v18 = vpop.xlane.xlu0 %1048 }
 0x469   : > { %2413 = vrcp.f32 %v1049_v18  ;;  %1317 = vrot.lane.b32.xlu1 %v2732_v53, %s2482_s12 }
 0x46a   : > { %v1052_v19 = vpop.xlane.xlu1 %1051 }
 0x46b   : > { %2415 = vrcp.f32 %v1052_v19 }
 0x46c   : > { %2417 = vpow2.f32 %v1438_v26 }
 0x473   : > { %v2414_v20 = vpop.eup %2413 }
 0x474   : > { %1183 = vrot.lane.b32.xlu0 %v2732_v53, %s2481_s22  ;;  %v1055_v22 = vmul.f32 %v2414_v20, %v2400_v48 }
 0x475   : > { %v2416_v21 = vpop.eup %2415 }
 0x476   : > { %v1056_v23 = vmul.f32 %v2416_v21, %v2402_v50  ;;  %v2418_v27 = vpop.eup %2417  ;;  %v2110_v21 = vld [vmem:[%s2940_s3] ss:$0 sm:$0xff] }
 0x477   : > { %v1443_v28 = vsel %vm985_vm3, %v2418_v27, 0.0 }
 0x478   : > { %v1057_v25 = vpack.c.bf16 %v1056_v23, %v1055_v22 }
 0x47a   : > { %2236 = vmatmul.mubr.msk.bf16.vlgmr.msra.gmra.mrb[12].mxu1 %vm985_vm3, %v1057_v25 }
 0x47b   : > { %2247 = vmatprep.mubr.msk.bf16.mxu1 %vm2480_vm2, %v2479_v17 }
 0x48d   : > { %1444 = vadd.xlane.f32.xlu1 %v1443_v28 }
 0x49e   : > { %1451 = vrot.lane.b32.xlu1 %v2732_v53, %s2483_s23 }
 0x4db   : > { %v1173_v29 = vpop.xlane.xlu0 %1172 }
 0x4df   : > { %v1176_v30 = vpop.xlane.xlu1 %1175 }
 0x4e0   : > { %2419 = vrcp.f32 %v1176_v30 }
 0x4e1   : > { %2421 = vrcp.f32 %v1173_v29 }
 0x4e3   : > { %v1308_v32 = vpop.xlane.xlu0 %1307 }
 0x4e5   : > { %v1311_v31 = vpop.xlane.xlu1 %1310 }
 0x4e6   : > { %2423 = vrcp.f32 %v1311_v31 }
 0x4e7   : > { %2425 = vrcp.f32 %v1308_v32 }
 0x4e9   : > { %v1318_v53 = vpop.permute.xlu1 %1317 }
 0x4ea   : > { %v2420_v33 = vpop.eup %2419 }
 0x4eb   : > { %v1442_v34 = vpop.xlane.xlu0 %1441  ;;  %v2422_v35 = vpop.eup %2421  ;;  %v1180_v36 = vmul.f32 %v2420_v33, %v2406_v7 }
 0x4ec   : > { %v1179_v37 = vmul.f32 %v2422_v35, %v2404_v1  ;;  %2427 = vrcp.f32 %v1442_v34 }
 0x4ee   : > { %v1181_v39 = vpack.c.bf16 %v1180_v36, %v1179_v37 }
 0x4ef   : > { %v1184_v38 = vpop.permute.xlu0 %1183 }
 0x4f0   : > { %2246 = vmatpush3.bf16.msra.mxu1 %v1184_v38  ;;  %v2424_v40 = vpop.eup %2423 }
 0x4f1   : > { %2257 = vmatprep.subr.bf16.mxu1 %v2479_v17  ;;  %v2426_v41 = vpop.eup %2425  ;;  %v1315_v42 = vmul.f32 %v2424_v40, %v2410_v12  ;;  %v2383_v40 = vld [vmem:[%s2645_s5] sm:$0xff]  }
 0x4f2   : > { %v1314_v43 = vmul.f32 %v2426_v41, %v2408_v10  ;;  %v2385_v41 = vld [vmem:[%s2645_s5 + $0x10] sm:$0xff]  }
 0x4f3   : > { %2248 = vmatmul.mubr.msk.bf16.vlgmr.msra.gmra.mrb[16].mxu1 %vm985_vm3, %v1181_v39 }
 0x4f4   : > { %2258 = vmatpush3.bf16.msra.mxu1 %v1318_v53  ;;  %2259 = vmatprep.mubr.msk.bf16.mxu1 %vm2480_vm2, %v2479_v17  ;;  %v1316_v44 = vpack.c.bf16 %v1315_v42, %v1314_v43  ;;  %v2384_v53 = vld [vmem:[%s2645_s5 + $0x8] sm:$0xff]   ;;  %v2386_v42 = vld [vmem:[%s2645_s5 + $0x18] sm:$0xff]  }
 0x4f5   : > { %2269 = vmatprep.subr.bf16.mxu1 %v2479_v17 }
 0x4f6   : > { %v2428_v47 = vpop.eup %2427 }
 0x4f7   : > { %v1448_v49 = vmul.f32 %v2428_v47, %v2412_v14 }
 0x4fb   : > { %2260 = vmatmul.mubr.msk.bf16.vlgmr.msra.gmra.mrb[20].mxu1 %vm985_vm3, %v1316_v44 }
 0x4fc   : > { %2271 = vmatprep.mubr.msk.bf16.mxu1 %vm2480_vm2, %v2479_v17 }
 0x51a   : > { %v1445_v45 = vpop.xlane.xlu1 %1444 }
 0x51b   : > { %2429 = vrcp.f32 %v1445_v45 }
 0x51e   : > { %v1452_v46 = vpop.permute.xlu1 %1451 }
 0x51f   : > { %2270 = vmatpush3.bf16.msra.mxu1 %v1452_v46 }
 0x520   : > { %2287 = vmatprep.subr.bf16.mxu1 %v2479_v17 }
 0x525   : > { %v2430_v48 = vpop.eup %2429 }
 0x526   : > { %v1449_v50 = vmul.f32 %v2430_v48, %v2418_v27 }
 0x528   : > { %v1450_v51 = vpack.c.bf16 %v1449_v50, %v1448_v49 }
 0x52a   : > { %2272 = vmatmul.mubr.msk.bf16.vlgmr.msra.gmra.mrb[24].mxu1 %vm985_vm3, %v1450_v51  ;;  %v2116_v51 = vld [vmem:[%s2942_s29] ss:$0 sm:$0xff] }
 0x52b   : > { %2295 = vmatprep.mubr.msk.bf16.mxu1 %vm2480_vm2, %v2479_v17  ;;  %2288 = vmatpush3.bf16.msra.mxu1 %v2383_v40 }
 0x52c   : > { %2289 = vmatprep.subr.bf16.mxu1 %v2479_v17 }
 0x52f   : > { %2290 = vmatpush3.bf16.msra.mxu1 %v2384_v53 }
 0x530   : > { %2291 = vmatprep.subr.bf16.mxu1 %v2479_v17 }
 0x533   : > { %2292 = vmatpush3.bf16.msra.mxu1 %v2385_v41 }
 0x534   : > { %2293 = vmatprep.subr.bf16.mxu1 %v2479_v17 }
 0x537   : > { %2294 = vmatpush3.bf16.msra.mxu1 %v2386_v42 }
 0x54d   : > { %v1095_v52 = vpop.f32.mrb[12].mxu1 }
 0x54e   : > { %1102 = vst.msk [vmem:[#allocation2] sm:$0xff] %vm985_vm3, %v1095_v52  ;;  %v2237_v54 = vpop.f32.mrb[13].mxu1 }
 0x54f   : > { %v1098_v55 = vpop.f32.mrb[14].mxu1 }
 0x550   : > { %1103 = vst.msk [vmem:[#allocation2 + $0x8] sm:$0xff] %vm985_vm3, %v1098_v55  ;;  %v2238_v56 = vpop.f32.mrb[15].mxu1 }
 0x551   : > { %v2117_v56 = vld [vmem:[%s2943_s28] ss:$0 sm:$0xff] }
 0x5c6   : > { %v1223_v58 = vpop.f32.mrb[16].mxu1 }
 0x5c7   : > { %1232 = vrot.lane.b32.xlu1 %v1223_v58, %s2484_s26  ;;  %v2249_v59 = vpop.f32.mrb[17].mxu1 }
 0x5c8   : > { %v1226_v60 = vpop.f32.mrb[18].mxu1 }
 0x5c9   : > { %1234 = vrot.lane.b32.xlu0 %v1226_v60, %s2484_s26  ;;  %v2250_v61 = vpop.f32.mrb[19].mxu1 }
 0x5ca   : > { %v2387_v61 = vld [vmem:[%s2659_s8] sm:$0xff]  }
 0x5ce   : > { %v1357_v62 = vpop.f32.mrb[20].mxu1 }
 0x5cf   : > { %1366 = vrot.lane.b32.xlu1 %v1357_v62, %s2485_s27  ;;  %v2261_v63 = vpop.f32.mrb[21].mxu1  ;;  %v2388_v62 = vld [vmem:[%s2659_s8 + $0x8] sm:$0xff]  }
 0x5d0   : > { %v1360_v0 = vpop.f32.mrb[22].mxu1  ;;  %v2389_v63 = vld [vmem:[%s2659_s8 + $0x10] sm:$0xff]  }
 0x5d1   : > { %1368 = vrot.lane.b32.xlu0 %v1360_v0, %s2485_s27  ;;  %v2262_v1 = vpop.f32.mrb[23].mxu1  ;;  %v2390_v0 = vld [vmem:[%s2659_s8 + $0x18] sm:$0xff]  }
 0x5d2   : > { %v2391_v1 = vld [vmem:[%s2659_s8 + $0x20] sm:$0xff]  }
 0x5fd   : > { %v1491_v7 = vpop.f32.mrb[24].mxu1 }
 0x5fe   : > { %1500 = vrot.lane.b32.xlu1 %v1491_v7, %s2486_s19  ;;  %v2273_v8 = vpop.f32.mrb[25].mxu1  ;;  %v2118_v7 = vld [vmem:[%s686_s6] ss:$0 sm:$0xff] }
 0x5ff   : > { %v1494_v9 = vpop.f32.mrb[26].mxu1 }
 0x600   : > { %1502 = vrot.lane.b32.xlu0 %v1494_v9, %s2486_s19  ;;  %v2274_v10 = vpop.f32.mrb[27].mxu1 }
 0x639   : > { %v1233_v11 = vpop.permute.xlu1 %1232 }
 0x63a   : > { %1239 = vst.msk [vmem:[#allocation2] sm:$0xff] %vm1238_vm4, %v1233_v11 }
 0x63b   : > { %v1235_v12 = vpop.permute.xlu0 %1234 }
 0x63c   : > { %1240 = vst.msk [vmem:[#allocation2 + $0x8] sm:$0xff] %vm1238_vm4, %v1235_v12 }
 0x641   : > { %v1367_v13 = vpop.permute.xlu1 %1366 }
 0x642   : > { %1373 = vst.msk [vmem:[#allocation2] sm:$0xff] %vm1372_vm5, %v1367_v13 }
 0x643   : > { %v1369_v14 = vpop.permute.xlu0 %1368 }
 0x644   : > { %1374 = vst.msk [vmem:[#allocation2 + $0x8] sm:$0xff] %vm1372_vm5, %v1369_v14 }
 0x670   : > { %v1501_v15 = vpop.permute.xlu1 %1500 }
 0x671   : > { %1507 = vst.msk [vmem:[#allocation2] sm:$0xff] %vm1506_vm6, %v1501_v15 }
 0x672   : > { %v1503_v16 = vpop.permute.xlu0 %1502 }
 0x673   : > { %1508 = vst.msk [vmem:[#allocation2 + $0x8] sm:$0xff] %vm1506_vm6, %v1503_v16 }
 0x678   : > { %v1509_v18 = vld [vmem:[#allocation2] sm:$0xff] }
 0x67a   : > { %v1510_v19 = vld [vmem:[#allocation2 + $0x8] sm:$0xff] }
 0x67b   : > { %v1511_v20 = vpack.c.bf16 %v1510_v19, %v1509_v18 }
 0x67d   : > { %2284 = vmatmul.mubr.msk.bf16.vlgmr.msra.gmra.mrb[16].mxu0 %vm715_vm1, %v1511_v20 }
 0x67e   : > { %2315 = vmatprep.mubr.msk.bf16.mxu0 %vm2480_vm2, %v2479_v17  ;;  %2300 = vmatpush3.bf16.msra.mxu0 %v2387_v61 }
 0x67f   : > { %2301 = vmatprep.subr.bf16.mxu0 %v2479_v17 }
 0x682   : > { %2302 = vmatpush3.bf16.msra.mxu0 %v2388_v62 }
 0x683   : > { %2303 = vmatprep.subr.bf16.mxu0 %v2479_v17 }
 0x686   : > { %2304 = vmatpush3.bf16.msra.mxu0 %v2389_v63 }
 0x687   : > { %2305 = vmatprep.subr.bf16.mxu0 %v2479_v17 }
 0x68a   : > { %2306 = vmatpush3.bf16.msra.mxu0 %v2390_v0 }
 0x68b   : > { %2307 = vmatprep.subr.bf16.mxu0 %v2479_v17 }
 0x68e   : > { %2308 = vmatpush3.bf16.msra.mxu0 %v2391_v1 }
 0x68f   : > { %2309 = vmatprep.subr.bf16.mxu0 %v2479_v17 }
 0x692   : > { %2310 = vmatpush3.bf16.msra.mxu0 %v2392_v4 }
 0x693   : > { %2311 = vmatprep.subr.bf16.mxu0 %v2479_v17 }
 0x696   : > { %2312 = vmatpush3.bf16.msra.mxu0 %v2393_v5 }
 0x697   : > { %2313 = vmatprep.subr.bf16.mxu0 %v2479_v17 }
 0x69a   : > { %2314 = vmatpush3.bf16.msra.mxu0 %v2394_v6 }
 0x750   : > { %v1588_v22 = vpop.f32.mrb[16].mxu0 }
 0x751   : > { %v1589_v23 = vadd.f32 %v2110_v21, %v1588_v22  ;;  %v2285_v24 = vpop.f32.mrb[17].mxu0 }
 0x752   : > { %v1591_v25 = vpop.f32.mrb[18].mxu0 }
 0x753   : > { %v1592_v26 = vadd.f32 %v2110_v21, %v1591_v25  ;;  %v2286_v27 = vpop.f32.mrb[19].mxu0  ;;  %v1595_v28 = vadd.f32 %v1589_v23, %v2670_v2 }
 0x755   : > { %v1599_v29 = vsel %vm715_vm1, %v1595_v28, 0.0  ;;  %v1596_v30 = vadd.f32 %v1592_v26, %v2673_v3 }
 0x756   : > { %1600 = vadd.xlane.f32.xlu1 %v1599_v29 }
 0x757   : > { %v1602_v31 = vsel %vm715_vm1, %v1596_v30, 0.0 }
 0x758   : > { %1603 = vadd.xlane.f32.xlu0 %v1602_v31 }
 0x7e3   : > { %v1601_v32 = vpop.xlane.xlu1 %1600 }
 0x7e4   : > { %v1605_v33 = vmul.f32 0.015625, %v1601_v32 }
 0x7e5   : > { %v1604_v34 = vpop.xlane.xlu0 %1603 }
 0x7e6   : > { %v1607_v35 = vsub.f32 %v1595_v28, %v1605_v33  ;;  %v1606_v36 = vmul.f32 0.015625, %v1604_v34  ;;  %v2124_v33 = vld [vmem:[%s694_s15] ss:$0 sm:$0xff] }
 0x7e8   : > { %v1608_v37 = vsub.f32 %v1596_v30, %v1606_v36  ;;  %v1609_v38 = vmul.f32 %v1607_v35, %v1607_v35 }
 0x7ea   : > { %v1611_v2 = vsel %vm715_vm1, %v1609_v38, 0.0  ;;  %v1610_v39 = vmul.f32 %v1608_v37, %v1608_v37 }
 0x7eb   : > { %1612 = vadd.xlane.f32.xlu0 %v1611_v2 }
 0x7ec   : > { %v1614_v3 = vsel %vm715_vm1, %v1610_v39, 0.0 }
 0x7ef   : > { %1615 = vadd.xlane.f32.xlu0 %v1614_v3 }
 0x878   : > { %v1613_v43 = vpop.xlane.xlu0 %1612 }
 0x879   : > { %v1617_v44 = vmul.f32 0.015625, %v1613_v43 }
 0x87b   : > { %v1619_v45 = vadd.f32 1e-05, %v1617_v44 }
 0x87c   : > { %v1616_v46 = vpop.xlane.xlu0 %1615 }
 0x87d   : > { %2431 = vrsqrt.f32 %v1619_v45  ;;  %v1618_v47 = vmul.f32 0.015625, %v1616_v46 }
 0x87f   : > { %v1620_v48 = vadd.f32 1e-05, %v1618_v47 }
 0x881   : > { %2433 = vrsqrt.f32 %v1620_v48 }
 0x887   : > { %v2432_v49 = vpop.eup %2431 }
 0x888   : > { %v1623_v50 = vmul.f32 %v2432_v49, %v1607_v35 }
 0x88a   : > { %v1631_v54 = vmul.f32 %v2116_v51, %v1623_v50 }
 0x88b   : > { %v2434_v52 = vpop.eup %2433 }
 0x88c   : > { %v1624_v55 = vmul.f32 %v2434_v52, %v1608_v37  ;;  %v1639_v58 = vadd.f32 %v2117_v56, %v1631_v54 }
 0x88e   : > { %v1632_v57 = vmul.f32 %v2116_v51, %v1624_v55 }
 0x890   : > { %v2844_v59 = vadd.f32 %v2117_v56, %v1632_v57 }
 0x892   : > { %v1641_v60 = vpack.c.bf16 %v2844_v59, %v1639_v58 }
 0x894   : > { %2296 = vmatmul.mubr.msk.bf16.vlgmr.msra.gmra.mrb[28].mxu1 %vm715_vm1, %v1641_v60 }
 0x967   : > { %v1718_v8 = vpop.f32.mrb[28].mxu1 }
 0x968   : > { %v1719_v9 = vadd.f32 %v2118_v7, %v1718_v8  ;;  %v2297_v10 = vpop.f32.mrb[29].mxu1 }
 0x969   : > { %v1721_v11 = vpop.f32.mrb[30].mxu1 }
 0x96a   : > { %v1725_v12 = vmul.f32 %v1719_v9, %v1719_v9  ;;  %v1722_v13 = vadd.f32 %v2118_v7, %v1721_v11  ;;  %v2298_v14 = vpop.f32.mrb[31].mxu1 }
 0x96c   : > { %v1727_v15 = vmul.f32 %v1725_v12, %v1719_v9  ;;  %v1726_v16 = vmul.f32 %v1722_v13, %v1722_v13 }
 0x96e   : > { %v1729_v18 = vmul.f32 0.044715, %v1727_v15  ;;  %v1728_v19 = vmul.f32 %v1726_v16, %v1722_v13 }
 0x970   : > { %v1731_v20 = vadd.f32 %v1729_v18, %v1719_v9  ;;  %v1730_v17 = vmul.f32 0.044715, %v1728_v19 }
 0x972   : > { %v1733_v21 = vmul.f32 0.7978846, %v1731_v20  ;;  %v1732_v22 = vadd.f32 %v1730_v17, %v1722_v13 }
 0x974   : > { %2435 = vtanh.f32 %v1733_v21  ;;  %v1734_v23 = vmul.f32 0.7978846, %v1732_v22 }
 0x976   : > { %2437 = vtanh.f32 %v1734_v23 }
 0x97e   : > { %v2436_v24 = vpop.eup %2435 }
 0x97f   : > { %v1737_v25 = vadd.f32 1.0, %v2436_v24 }
 0x980   : > { %v2438_v26 = vpop.eup %2437 }
 0x981   : > { %v1739_v27 = vmul.f32 0.5, %v1737_v25  ;;  %v1738_v28 = vadd.f32 1.0, %v2438_v26 }
 0x983   : > { %v1740_v29 = vmul.f32 0.5, %v1738_v28  ;;  %v1741_v30 = vmul.f32 %v1739_v27, %v1719_v9 }
 0x985   : > { %v1742_v31 = vmul.f32 %v1740_v29, %v1722_v13 }
 0x987   : > { %v1743_v32 = vpack.c.bf16 %v1742_v31, %v1741_v30 }
 0x989   : > { %2316 = vmatmul.mubr.bf16.vlgmr.msra.gmra.mrb[20].mxu0 %v1743_v32 }
 0xa5c   : > { %v1849_v34 = vpop.f32.mrb[20].mxu0 }
 0xa5d   : > { %v1850_v35 = vadd.f32 %v2124_v33, %v1849_v34  ;;  %v2317_v36 = vpop.f32.mrb[21].mxu0 }
 0xa5e   : > { %v1852_v37 = vpop.f32.mrb[22].mxu0 }
 0xa5f   : > { %v1856_v38 = vadd.f32 %v1850_v35, %v1639_v58  ;;  %v1853_v2 = vadd.f32 %v2124_v33, %v1852_v37  ;;  %v2318_v39 = vpop.f32.mrb[23].mxu0 }
 0xa61   : > { %1858 = vst.msk [vmem:[%s2664_s24] sm:$0xff] %vm715_vm1, %v1856_v38  ;;  %v1857_v3 = vadd.f32 %v1853_v2, %v2844_v59 }
 0xa63   : > { %1859 = vst.msk [vmem:[%s2664_s24 + $0x8] sm:$0xff] %vm715_vm1, %v1857_v3 }
 0xa64 PF: > { %s2944_s22 = sld [smem:[#allocation6_spill]]  ;;  %s2945_s29 = sld [smem:[#allocation4_spill]] }
 0xa65   : > { %s2946_s30 = sld [smem:[#allocation5_spill]]  ;;  %s2947_s15 = sld [smem:[#allocation7_spill]] }
 0xa66   : > { %s2948_s16 = sld [smem:[#allocation8_spill]] }
 0xa6a   : > { %s24_s17 = sadd.s32 1, %s2944_s22  }
 0xa6b   : > { %p21_p8 = scmp.ge.s32.totalorder %s24_s17, 6  }
 0xa6d   :  { %23 = sbr.rel (!%p21_p8) target bundleno = 9 (0x9), region = 149 }

</bundles_post_ra>
